<compile_context>
chip_gen: v7x
topology: tpu7x:2x2x1
jax: 0.10.0
libtpu: 0.0.40
codegen_flags: <defaults>
</compile_context>

<pallas_src>
import jax
import jax.numpy as jnp
from jax.experimental import pallas as pl
from jax.experimental.pallas import tpu as pltpu


# ----------------------------- Pallas kernel -------------------------------

def _make_bottleneck_kernel(offs1, offs2, L, add_residual):
    """SiLU(BN(conv1(x))) -> SiLU(BN(conv2(.))) [+ x], fused in one kernel.

    Activations are (C, L): channels on sublanes, the flattened zero-padded
    spatial frame (length L, lane-tile aligned) on lanes.  offs1/offs2 are the
    static flat tap offsets (dy*Wq + dx) of the two convolutions.
    """

    def _roll_lanes(a, off):
        # rolled[:, p] == a[:, (p + off) % L]   (static off; two lane slices)
        s = off % L
        if s == 0:
            return a
        return jnp.concatenate([a[:, s:], a[:, :s]], axis=-1)

    def kernel(x_ref, w1_ref, b1_ref, w2_ref, b2_ref, mask_ref, o_ref):
        xq = x_ref[0]                                   # (C1, L), input dtype

        # ---- stage 1: im2col via lane rolls, ONE GEMM, bias + SiLU --------
        patch1 = jnp.concatenate([_roll_lanes(xq, o) for o in offs1], axis=0)
        y = jnp.dot(w1_ref[...], patch1, preferred_element_type=jnp.float32)
        y = y + b1_ref[...]                             # folded-BN bias
        y = y * jax.nn.sigmoid(y)                       # SiLU (EUP sigmoid)
        # Zero the frame halo / flat tail so stage 2 reads proper zero padding
        # (only a mask multiply; no full-scratch zero-fill store passes).
        y = (y * mask_ref[...]).astype(xq.dtype)

        # ---- stage 2: same pattern over the VMEM-resident intermediate ----
        patch2 = jnp.concatenate([_roll_lanes(y, o) for o in offs2], axis=0)
        z = jnp.dot(w2_ref[...], patch2, preferred_element_type=jnp.float32)
        z = z + b2_ref[...]
        z = z * jax.nn.sigmoid(z)

        if add_residual:
            z = z + xq.astype(jnp.float32)              # pad region is zero

        o_ref[0] = z.astype(o_ref.dtype)                # lane-dense store

    return kernel


# ------------------------------- wrappers -----------------------------------

def _fold_bn(gamma, beta, running_mean, running_var, eps=1e-3):
    # eps=1e-3 matches nn.BatchNorm2d(eps=0.001) of the reference Conv block.
    scale = gamma / jnp.sqrt(running_var + eps)
    bias = beta - running_mean * scale
    return scale, bias


def _conv_matrix(w_oihw, bn_scale, dtype):
    """(Cout, Cin, K, K) weight (+ folded BN scale) -> (Cout, K*K*Cin) GEMM
    matrix whose column order (tap-major, channel-minor) matches the patch."""
    cout, cin, k, _ = w_oihw.shape
    w = jnp.transpose(w_oihw, (0, 2, 3, 1)) * bn_scale[:, None, None, None]
    return w.reshape(cout, k * k * cin).astype(dtype)


def bottleneck_forward(params, x):
    """Full Bottleneck forward on an NCHW input (PyTorch layout)."""
    N, C1, H, W = x.shape
    w1, w2 = params["w1"], params["w2"]                 # OIHW (PyTorch layout)
    Cm, _, K1, _ = w1.shape
    C2, _, K2, _ = w2.shape
    assert K1 % 2 == 1 and K2 % 2 == 1, "autopad=k//2 assumes odd kernel sizes"
    p1, p2 = K1 // 2, K2 // 2

    add_residual = bool(params["add"])
    if add_residual:
        assert C1 == C2, "residual add requires c1 == c2"

    # Spatial frame: pad by m on each side, flatten, pad flat length to a
    # multiple of 128 so the lane axis is tile-aligned (unmasked stores).
    m = max(p1, p2)
    Hq, Wq = H + 2 * m, W + 2 * m
    Lq = Hq * Wq
    LPAD = ((Lq + 127) // 128) * 128

    s1, b1 = _fold_bn(*params["bn1"])
    s2, b2 = _fold_bn(*params["bn2"])
    w1m = _conv_matrix(w1, s1, x.dtype)                 # (Cm, K1*K1*C1)
    w2m = _conv_matrix(w2, s2, x.dtype)                 # (C2, K2*K2*Cm)
    b1c = b1.reshape(Cm, 1).astype(jnp.float32)
    b2c = b2.reshape(C2, 1).astype(jnp.float32)

    # Zero-padded flat frame, channels-first (native NCHW -> just pad+reshape).
    xq = jnp.pad(x, ((0, 0), (0, 0), (m, m), (m, m))).reshape(N, C1, Lq)
    xq = jnp.pad(xq, ((0, 0), (0, 0), (0, LPAD - Lq)))

    # 1 on the true image box of the frame, 0 on the halo ring / flat tail.
    rr = jnp.arange(Hq)[:, None]
    cc = jnp.arange(Wq)[None, :]
    mask = (rr >= m) & (rr < m + H) & (cc >= m) & (cc < m + W)
    mask = jnp.pad(mask.reshape(1, Lq).astype(jnp.float32),
                   ((0, 0), (0, LPAD - Lq)))

    # Static flat tap offsets (dy*Wq + dx) for both convolutions.
    offs1 = tuple((ky - p1) * Wq + (kx - p1)
                  for ky in range(K1) for kx in range(K1))
    offs2 = tuple((ky - p2) * Wq + (kx - p2)
                  for ky in range(K2) for kx in range(K2))

    kernel = _make_bottleneck_kernel(offs1, offs2, LPAD, add_residual)

    def build_call(single_buffer_consts):
        if single_buffer_consts:
            def cspec(shape):
                return pl.BlockSpec(shape, lambda n: (0,) * len(shape),
                                    pipeline_mode=pl.Buffered(1))
        else:
            def cspec(shape):
                return pl.BlockSpec(shape, lambda n: (0,) * len(shape))
        return pl.pallas_call(
            kernel,
            out_shape=jax.ShapeDtypeStruct((N, C2, LPAD), x.dtype),
            grid=(N,),
            in_specs=[
                pl.BlockSpec((1, C1, LPAD), lambda n: (n, 0, 0)),
                cspec((Cm, K1 * K1 * C1)),
                cspec((Cm, 1)),
                cspec((C2, K2 * K2 * Cm)),
                cspec((C2, 1)),
                cspec((1, LPAD)),
            ],
            out_specs=pl.BlockSpec((1, C2, LPAD), lambda n: (n, 0, 0)),
            compiler_params=pltpu.CompilerParams(
                dimension_semantics=("parallel",)),
        )

    args = (xq, w1m, b1c, w2m, b2c, mask)
    try:
        out = build_call(True)(*args)     # constants single-buffered
    except Exception:                     # Buffered(1) unsupported -> default specs
        out = build_call(False)(*args)

    # Frame -> NCHW image: drop the flat tail, un-flatten, crop the halo.
    out = out[:, :, :Lq].reshape(N, C2, Hq, Wq)[:, :, m:m + H, m:m + W]
    return out


# --------------------------- parameter helpers -------------------------------

def init_bottleneck_params(key, c1, c2, shortcut=True, k=(3, 3), e=0.5):
    # TODO(synk): grouped conv (g>1) in cv2 is not implemented (g=1 only).
    # TODO(synk): training-mode BatchNorm (batch-stat / momentum updates) is not
    #             implemented; BN is folded from running stats (eval mode).
    c_ = int(c2 * e)
    keys = jax.random.split(key, 8)
    params = {
        "w1": 0.1 * jax.random.normal(keys[0], (c_, c1, k[0], k[0]), jnp.float32),
        "bn1": (1.0 + 0.05 * jax.random.normal(keys[1], (c_,)),       # gamma
                0.05 * jax.random.normal(keys[2], (c_,)),             # beta
                0.05 * jax.random.normal(keys[3], (c_,)),             # running_mean
                1.0 + 0.1 * jax.random.uniform(keys[4], (c_,))),      # running_var
        "w2": 0.1 * jax.random.normal(keys[5], (c2, c_, k[1], k[1]), jnp.float32),
        "bn2": (1.0 + 0.05 * jax.random.normal(keys[6], (c2,)),
                0.05 * jax.random.normal(keys[7], (c2,)),
                jnp.zeros((c2,)),
                jnp.ones((c2,))),
        "add": bool(shortcut and c1 == c2),
    }
    return params


# Pure-JAX reference for sanity checking the fused kernel.
def _reference_forward(params, x):
    def conv_bn_silu(h, w_oihw, bn):
        scale, bias = _fold_bn(*bn)
        y = jax.lax.conv_general_dilated(
            h, w_oihw, window_strides=(1, 1), padding="SAME",
            dimension_numbers=("NCHW", "OIHW", "NCHW"))
        y = y * scale[None, :, None, None] + bias[None, :, None, None]
        return y * jax.nn.sigmoid(y)

    y = conv_bn_silu(x, params["w1"], params["bn1"])
    z = conv_bn_silu(y, params["w2"], params["bn2"])
    if params["add"]:
        z = z + x
    return z


if __name__ == "__main__":
    key = jax.random.PRNGKey(0)
    kx, kp = jax.random.split(key)

    N, C, H, W = 2, 4, 16, 16          # c1 == c2 == 4 -> residual add active
    x = jax.random.normal(kx, (N, C, H, W), jnp.float32)

    params = init_bottleneck_params(kp, c1=C, c2=C, shortcut=True, k=(3, 3), e=0.5)

    out = jax.block_until_ready(bottleneck_forward(params, x))
    ref = jax.block_until_ready(_reference_forward(params, x))

    assert out.shape == (N, C, H, W)
    assert jnp.allclose(out, ref, rtol=1e-4, atol=1e-4), "mismatch vs reference"
    print("KERNEL_OK")
</pallas_src>

<mosaic_0001>
module attributes {stable_mosaic.version = 11 : i64} {
  func.func @kernel(%arg0: i32, %arg1: memref<1x4x384xf32, #tpu.memory_space<vmem>>, %arg2: memref<2x36xf32, #tpu.memory_space<vmem>>, %arg3: memref<2x1xf32, #tpu.memory_space<vmem>>, %arg4: memref<4x18xf32, #tpu.memory_space<vmem>>, %arg5: memref<4x1xf32, #tpu.memory_space<vmem>>, %arg6: memref<1x384xf32, #tpu.memory_space<vmem>>, %arg7: memref<1x4x384xf32, #tpu.memory_space<vmem>>) attributes {dimension_semantics = [#tpu.dimension_semantics<parallel>], iteration_bounds = array<i64: 2>, scalar_prefetch = 0 : i64, scratch_operands = 0 : i64, tpu.core_type = #tpu.core_type<tc>, window_params = [{transform_indices = @transform_0, window_bounds = array<i64: 1, 4, 384>}, {pipeline_mode = #tpu.pipeline_mode<synchronous>, transform_indices = @transform_1, window_bounds = array<i64: 2, 36>}, {pipeline_mode = #tpu.pipeline_mode<synchronous>, transform_indices = @transform_2, window_bounds = array<i64: 2, 1>}, {pipeline_mode = #tpu.pipeline_mode<synchronous>, transform_indices = @transform_3, window_bounds = array<i64: 4, 18>}, {pipeline_mode = #tpu.pipeline_mode<synchronous>, transform_indices = @transform_4, window_bounds = array<i64: 4, 1>}, {pipeline_mode = #tpu.pipeline_mode<synchronous>, transform_indices = @transform_5, window_bounds = array<i64: 1, 384>}, {transform_indices = @transform_6, window_bounds = array<i64: 1, 4, 384>}]} {
    %c0 = arith.constant 0 : index
    %c0_0 = arith.constant 0 : index
    %c0_1 = arith.constant 0 : index
    %0 = vector.load %arg1[%c0, %c0_0, %c0_1] : memref<1x4x384xf32, #tpu.memory_space<vmem>>, vector<1x4x384xf32>
    %1 = vector.shape_cast %0 : vector<1x4x384xf32> to vector<4x384xf32>
    %2 = vector.extract_strided_slice %1 {offsets = [0, 365], sizes = [4, 19], strides = [1, 1]} : vector<4x384xf32> to vector<4x19xf32>
    %3 = vector.extract_strided_slice %1 {offsets = [0, 0], sizes = [4, 365], strides = [1, 1]} : vector<4x384xf32> to vector<4x365xf32>
    %4 = tpu.concatenate %2, %3 in 1 : vector<4x19xf32>, vector<4x365xf32> -> vector<4x384xf32>
    %5 = vector.extract_strided_slice %1 {offsets = [0, 366], sizes = [4, 18], strides = [1, 1]} : vector<4x384xf32> to vector<4x18xf32>
    %6 = vector.extract_strided_slice %1 {offsets = [0, 0], sizes = [4, 366], strides = [1, 1]} : vector<4x384xf32> to vector<4x366xf32>
    %7 = tpu.concatenate %5, %6 in 1 : vector<4x18xf32>, vector<4x366xf32> -> vector<4x384xf32>
    %8 = vector.extract_strided_slice %1 {offsets = [0, 367], sizes = [4, 17], strides = [1, 1]} : vector<4x384xf32> to vector<4x17xf32>
    %9 = vector.extract_strided_slice %1 {offsets = [0, 0], sizes = [4, 367], strides = [1, 1]} : vector<4x384xf32> to vector<4x367xf32>
    %10 = tpu.concatenate %8, %9 in 1 : vector<4x17xf32>, vector<4x367xf32> -> vector<4x384xf32>
    %11 = vector.extract_strided_slice %1 {offsets = [0, 383], sizes = [4, 1], strides = [1, 1]} : vector<4x384xf32> to vector<4x1xf32>
    %12 = vector.extract_strided_slice %1 {offsets = [0, 0], sizes = [4, 383], strides = [1, 1]} : vector<4x384xf32> to vector<4x383xf32>
    %13 = tpu.concatenate %11, %12 in 1 : vector<4x1xf32>, vector<4x383xf32> -> vector<4x384xf32>
    %14 = vector.extract_strided_slice %1 {offsets = [0, 1], sizes = [4, 383], strides = [1, 1]} : vector<4x384xf32> to vector<4x383xf32>
    %15 = vector.extract_strided_slice %1 {offsets = [0, 0], sizes = [4, 1], strides = [1, 1]} : vector<4x384xf32> to vector<4x1xf32>
    %16 = tpu.concatenate %14, %15 in 1 : vector<4x383xf32>, vector<4x1xf32> -> vector<4x384xf32>
    %17 = vector.extract_strided_slice %1 {offsets = [0, 17], sizes = [4, 367], strides = [1, 1]} : vector<4x384xf32> to vector<4x367xf32>
    %18 = vector.extract_strided_slice %1 {offsets = [0, 0], sizes = [4, 17], strides = [1, 1]} : vector<4x384xf32> to vector<4x17xf32>
    %19 = tpu.concatenate %17, %18 in 1 : vector<4x367xf32>, vector<4x17xf32> -> vector<4x384xf32>
    %20 = vector.extract_strided_slice %1 {offsets = [0, 18], sizes = [4, 366], strides = [1, 1]} : vector<4x384xf32> to vector<4x366xf32>
    %21 = vector.extract_strided_slice %1 {offsets = [0, 0], sizes = [4, 18], strides = [1, 1]} : vector<4x384xf32> to vector<4x18xf32>
    %22 = tpu.concatenate %20, %21 in 1 : vector<4x366xf32>, vector<4x18xf32> -> vector<4x384xf32>
    %23 = vector.extract_strided_slice %1 {offsets = [0, 19], sizes = [4, 365], strides = [1, 1]} : vector<4x384xf32> to vector<4x365xf32>
    %24 = vector.extract_strided_slice %1 {offsets = [0, 0], sizes = [4, 19], strides = [1, 1]} : vector<4x384xf32> to vector<4x19xf32>
    %25 = tpu.concatenate %23, %24 in 1 : vector<4x365xf32>, vector<4x19xf32> -> vector<4x384xf32>
    %26 = tpu.concatenate %4, %7, %10, %13, %1, %16, %19, %22, %25 in 0 : vector<4x384xf32>, vector<4x384xf32>, vector<4x384xf32>, vector<4x384xf32>, vector<4x384xf32>, vector<4x384xf32>, vector<4x384xf32>, vector<4x384xf32>, vector<4x384xf32> -> vector<36x384xf32>
    %c0_2 = arith.constant 0 : index
    %c0_3 = arith.constant 0 : index
    %27 = vector.load %arg2[%c0_2, %c0_3] : memref<2x36xf32, #tpu.memory_space<vmem>>, vector<2x36xf32>
    %cst = arith.constant dense<0.000000e+00> : vector<2x384xf32>
    %28 = tpu.matmul %27, %26, %cst {dimension_numbers = #tpu.dot_dimension_numbers<[1], [0], [0], [1], [0, 0, 1, 1], [], []>} : vector<2x36xf32>, vector<36x384xf32>, vector<2x384xf32> -> vector<2x384xf32>
    %c0_4 = arith.constant 0 : index
    %c0_5 = arith.constant 0 : index
    %29 = vector.load %arg3[%c0_4, %c0_5] : memref<2x1xf32, #tpu.memory_space<vmem>>, vector<2x1xf32>
    %30 = vector.broadcast %29 : vector<2x1xf32> to vector<2x384xf32>
    %31 = arith.addf %28, %30 : vector<2x384xf32>
    %32 = arith.negf %31 : vector<2x384xf32>
    %33 = math.exp %32 : vector<2x384xf32>
    %cst_6 = arith.constant 1.000000e+00 : f32
    %34 = vector.broadcast %cst_6 : f32 to vector<2x384xf32>
    %35 = arith.addf %34, %33 : vector<2x384xf32>
    %36 = arith.divf %34, %35 : vector<2x384xf32>
    %37 = arith.mulf %31, %36 : vector<2x384xf32>
    %c0_7 = arith.constant 0 : index
    %c0_8 = arith.constant 0 : index
    %38 = vector.load %arg6[%c0_7, %c0_8] : memref<1x384xf32, #tpu.memory_space<vmem>>, vector<1x384xf32>
    %39 = vector.broadcast %38 : vector<1x384xf32> to vector<2x384xf32>
    %40 = arith.mulf %37, %39 : vector<2x384xf32>
    %41 = vector.extract_strided_slice %40 {offsets = [0, 365], sizes = [2, 19], strides = [1, 1]} : vector<2x384xf32> to vector<2x19xf32>
    %42 = vector.extract_strided_slice %40 {offsets = [0, 0], sizes = [2, 365], strides = [1, 1]} : vector<2x384xf32> to vector<2x365xf32>
    %43 = tpu.concatenate %41, %42 in 1 : vector<2x19xf32>, vector<2x365xf32> -> vector<2x384xf32>
    %44 = vector.extract_strided_slice %40 {offsets = [0, 366], sizes = [2, 18], strides = [1, 1]} : vector<2x384xf32> to vector<2x18xf32>
    %45 = vector.extract_strided_slice %40 {offsets = [0, 0], sizes = [2, 366], strides = [1, 1]} : vector<2x384xf32> to vector<2x366xf32>
    %46 = tpu.concatenate %44, %45 in 1 : vector<2x18xf32>, vector<2x366xf32> -> vector<2x384xf32>
    %47 = vector.extract_strided_slice %40 {offsets = [0, 367], sizes = [2, 17], strides = [1, 1]} : vector<2x384xf32> to vector<2x17xf32>
    %48 = vector.extract_strided_slice %40 {offsets = [0, 0], sizes = [2, 367], strides = [1, 1]} : vector<2x384xf32> to vector<2x367xf32>
    %49 = tpu.concatenate %47, %48 in 1 : vector<2x17xf32>, vector<2x367xf32> -> vector<2x384xf32>
    %50 = vector.extract_strided_slice %40 {offsets = [0, 383], sizes = [2, 1], strides = [1, 1]} : vector<2x384xf32> to vector<2x1xf32>
    %51 = vector.extract_strided_slice %40 {offsets = [0, 0], sizes = [2, 383], strides = [1, 1]} : vector<2x384xf32> to vector<2x383xf32>
    %52 = tpu.concatenate %50, %51 in 1 : vector<2x1xf32>, vector<2x383xf32> -> vector<2x384xf32>
    %53 = vector.extract_strided_slice %40 {offsets = [0, 1], sizes = [2, 383], strides = [1, 1]} : vector<2x384xf32> to vector<2x383xf32>
    %54 = vector.extract_strided_slice %40 {offsets = [0, 0], sizes = [2, 1], strides = [1, 1]} : vector<2x384xf32> to vector<2x1xf32>
    %55 = tpu.concatenate %53, %54 in 1 : vector<2x383xf32>, vector<2x1xf32> -> vector<2x384xf32>
    %56 = vector.extract_strided_slice %40 {offsets = [0, 17], sizes = [2, 367], strides = [1, 1]} : vector<2x384xf32> to vector<2x367xf32>
    %57 = vector.extract_strided_slice %40 {offsets = [0, 0], sizes = [2, 17], strides = [1, 1]} : vector<2x384xf32> to vector<2x17xf32>
    %58 = tpu.concatenate %56, %57 in 1 : vector<2x367xf32>, vector<2x17xf32> -> vector<2x384xf32>
    %59 = vector.extract_strided_slice %40 {offsets = [0, 18], sizes = [2, 366], strides = [1, 1]} : vector<2x384xf32> to vector<2x366xf32>
    %60 = vector.extract_strided_slice %40 {offsets = [0, 0], sizes = [2, 18], strides = [1, 1]} : vector<2x384xf32> to vector<2x18xf32>
    %61 = tpu.concatenate %59, %60 in 1 : vector<2x366xf32>, vector<2x18xf32> -> vector<2x384xf32>
    %62 = vector.extract_strided_slice %40 {offsets = [0, 19], sizes = [2, 365], strides = [1, 1]} : vector<2x384xf32> to vector<2x365xf32>
    %63 = vector.extract_strided_slice %40 {offsets = [0, 0], sizes = [2, 19], strides = [1, 1]} : vector<2x384xf32> to vector<2x19xf32>
    %64 = tpu.concatenate %62, %63 in 1 : vector<2x365xf32>, vector<2x19xf32> -> vector<2x384xf32>
    %65 = tpu.concatenate %43, %46, %49, %52, %40, %55, %58, %61, %64 in 0 : vector<2x384xf32>, vector<2x384xf32>, vector<2x384xf32>, vector<2x384xf32>, vector<2x384xf32>, vector<2x384xf32>, vector<2x384xf32>, vector<2x384xf32>, vector<2x384xf32> -> vector<18x384xf32>
    %c0_9 = arith.constant 0 : index
    %c0_10 = arith.constant 0 : index
    %66 = vector.load %arg4[%c0_9, %c0_10] : memref<4x18xf32, #tpu.memory_space<vmem>>, vector<4x18xf32>
    %cst_11 = arith.constant dense<0.000000e+00> : vector<4x384xf32>
    %67 = tpu.matmul %66, %65, %cst_11 {dimension_numbers = #tpu.dot_dimension_numbers<[1], [0], [0], [1], [0, 0, 1, 1], [], []>} : vector<4x18xf32>, vector<18x384xf32>, vector<4x384xf32> -> vector<4x384xf32>
    %c0_12 = arith.constant 0 : index
    %c0_13 = arith.constant 0 : index
    %68 = vector.load %arg5[%c0_12, %c0_13] : memref<4x1xf32, #tpu.memory_space<vmem>>, vector<4x1xf32>
    %69 = vector.broadcast %68 : vector<4x1xf32> to vector<4x384xf32>
    %70 = arith.addf %67, %69 : vector<4x384xf32>
    %71 = arith.negf %70 : vector<4x384xf32>
    %72 = math.exp %71 : vector<4x384xf32>
    %cst_14 = arith.constant 1.000000e+00 : f32
    %73 = vector.broadcast %cst_14 : f32 to vector<4x384xf32>
    %74 = arith.addf %73, %72 : vector<4x384xf32>
    %75 = arith.divf %73, %74 : vector<4x384xf32>
    %76 = arith.mulf %70, %75 : vector<4x384xf32>
    %77 = arith.addf %76, %1 : vector<4x384xf32>
    %c0_15 = arith.constant 0 : index
    %c0_16 = arith.constant 0 : index
    %c0_17 = arith.constant 0 : index
    %78 = vector.load %arg7[%c0_15, %c0_16, %c0_17] : memref<1x4x384xf32, #tpu.memory_space<vmem>>, vector<1x4x384xf32>
    %79 = vector.shape_cast %78 : vector<1x4x384xf32> to vector<4x384xf32>
    %80 = vector.shape_cast %77 : vector<4x384xf32> to vector<1x4x384xf32>
    tpu.vector_store %arg7[%c0_15, %c0_16, %c0_17], %80 {strides = array<i32>} : memref<1x4x384xf32, #tpu.memory_space<vmem>>, vector<1x4x384xf32>,
    return
  }
  func.func @transform_0(%arg0: i32) -> (i32, i32, i32) {
    %c0_i32 = arith.constant 0 : i32
    %c0_i32_0 = arith.constant 0 : i32
    %c0_i32_1 = arith.constant 0 : i32
    return %arg0, %c0_i32, %c0_i32_0 : i32, i32, i32
  }
  func.func @transform_1(%arg0: i32) -> (i32, i32) {
    %c0_i32 = arith.constant 0 : i32
    %c0_i32_0 = arith.constant 0 : i32
    %c0_i32_1 = arith.constant 0 : i32
    return %c0_i32, %c0_i32_0 : i32, i32
  }
  func.func @transform_2(%arg0: i32) -> (i32, i32) {
    %c0_i32 = arith.constant 0 : i32
    %c0_i32_0 = arith.constant 0 : i32
    %c0_i32_1 = arith.constant 0 : i32
    return %c0_i32, %c0_i32_0 : i32, i32
  }
  func.func @transform_3(%arg0: i32) -> (i32, i32) {
    %c0_i32 = arith.constant 0 : i32
    %c0_i32_0 = arith.constant 0 : i32
    %c0_i32_1 = arith.constant 0 : i32
    return %c0_i32, %c0_i32_0 : i32, i32
  }
  func.func @transform_4(%arg0: i32) -> (i32, i32) {
    %c0_i32 = arith.constant 0 : i32
    %c0_i32_0 = arith.constant 0 : i32
    %c0_i32_1 = arith.constant 0 : i32
    return %c0_i32, %c0_i32_0 : i32, i32
  }
  func.func @transform_5(%arg0: i32) -> (i32, i32) {
    %c0_i32 = arith.constant 0 : i32
    %c0_i32_0 = arith.constant 0 : i32
    %c0_i32_1 = arith.constant 0 : i32
    return %c0_i32, %c0_i32_0 : i32, i32
  }
  func.func @transform_6(%arg0: i32) -> (i32, i32, i32) {
    %c0_i32 = arith.constant 0 : i32
    %c0_i32_0 = arith.constant 0 : i32
    %c0_i32_1 = arith.constant 0 : i32
    return %arg0, %c0_i32, %c0_i32_0 : i32, i32, i32
  }
}

module attributes {stable_mosaic.version = 11 : i64} {
  func.func @kernel(%arg0: i32, %arg1: memref<1x4x384xf32, #tpu.memory_space<vmem>>, %arg2: memref<2x36xf32, #tpu.memory_space<vmem>>, %arg3: memref<2x1xf32, #tpu.memory_space<vmem>>, %arg4: memref<4x18xf32, #tpu.memory_space<vmem>>, %arg5: memref<4x1xf32, #tpu.memory_space<vmem>>, %arg6: memref<1x384xf32, #tpu.memory_space<vmem>>, %arg7: memref<1x4x384xf32, #tpu.memory_space<vmem>>) attributes {dimension_semantics = [#tpu.dimension_semantics<parallel>], iteration_bounds = array<i64: 2>, scalar_prefetch = 0 : i64, scratch_operands = 0 : i64, tpu.core_type = #tpu.core_type<tc>, window_params = [{transform_indices = @transform_0, window_bounds = array<i64: 1, 4, 384>}, {pipeline_mode = #tpu.pipeline_mode<synchronous>, transform_indices = @transform_1, window_bounds = array<i64: 2, 36>}, {pipeline_mode = #tpu.pipeline_mode<synchronous>, transform_indices = @transform_2, window_bounds = array<i64: 2, 1>}, {pipeline_mode = #tpu.pipeline_mode<synchronous>, transform_indices = @transform_3, window_bounds = array<i64: 4, 18>}, {pipeline_mode = #tpu.pipeline_mode<synchronous>, transform_indices = @transform_4, window_bounds = array<i64: 4, 1>}, {pipeline_mode = #tpu.pipeline_mode<synchronous>, transform_indices = @transform_5, window_bounds = array<i64: 1, 384>}, {transform_indices = @transform_6, window_bounds = array<i64: 1, 4, 384>}]} {
    %c0 = arith.constant 0 : index
    %c0_0 = arith.constant 0 : index
    %c0_1 = arith.constant 0 : index
    %0 = vector.load %arg1[%c0, %c0_0, %c0_1] : memref<1x4x384xf32, #tpu.memory_space<vmem>>, vector<1x4x384xf32>
    %1 = vector.shape_cast %0 : vector<1x4x384xf32> to vector<4x384xf32>
    %2 = vector.extract_strided_slice %1 {offsets = [0, 365], sizes = [4, 19], strides = [1, 1]} : vector<4x384xf32> to vector<4x19xf32>
    %3 = vector.extract_strided_slice %1 {offsets = [0, 0], sizes = [4, 365], strides = [1, 1]} : vector<4x384xf32> to vector<4x365xf32>
    %4 = tpu.concatenate %2, %3 in 1 : vector<4x19xf32>, vector<4x365xf32> -> vector<4x384xf32>
    %5 = vector.extract_strided_slice %1 {offsets = [0, 366], sizes = [4, 18], strides = [1, 1]} : vector<4x384xf32> to vector<4x18xf32>
    %6 = vector.extract_strided_slice %1 {offsets = [0, 0], sizes = [4, 366], strides = [1, 1]} : vector<4x384xf32> to vector<4x366xf32>
    %7 = tpu.concatenate %5, %6 in 1 : vector<4x18xf32>, vector<4x366xf32> -> vector<4x384xf32>
    %8 = vector.extract_strided_slice %1 {offsets = [0, 367], sizes = [4, 17], strides = [1, 1]} : vector<4x384xf32> to vector<4x17xf32>
    %9 = vector.extract_strided_slice %1 {offsets = [0, 0], sizes = [4, 367], strides = [1, 1]} : vector<4x384xf32> to vector<4x367xf32>
    %10 = tpu.concatenate %8, %9 in 1 : vector<4x17xf32>, vector<4x367xf32> -> vector<4x384xf32>
    %11 = vector.extract_strided_slice %1 {offsets = [0, 383], sizes = [4, 1], strides = [1, 1]} : vector<4x384xf32> to vector<4x1xf32>
    %12 = vector.extract_strided_slice %1 {offsets = [0, 0], sizes = [4, 383], strides = [1, 1]} : vector<4x384xf32> to vector<4x383xf32>
    %13 = tpu.concatenate %11, %12 in 1 : vector<4x1xf32>, vector<4x383xf32> -> vector<4x384xf32>
    %14 = vector.extract_strided_slice %1 {offsets = [0, 1], sizes = [4, 383], strides = [1, 1]} : vector<4x384xf32> to vector<4x383xf32>
    %15 = vector.extract_strided_slice %1 {offsets = [0, 0], sizes = [4, 1], strides = [1, 1]} : vector<4x384xf32> to vector<4x1xf32>
    %16 = tpu.concatenate %14, %15 in 1 : vector<4x383xf32>, vector<4x1xf32> -> vector<4x384xf32>
    %17 = vector.extract_strided_slice %1 {offsets = [0, 17], sizes = [4, 367], strides = [1, 1]} : vector<4x384xf32> to vector<4x367xf32>
    %18 = vector.extract_strided_slice %1 {offsets = [0, 0], sizes = [4, 17], strides = [1, 1]} : vector<4x384xf32> to vector<4x17xf32>
    %19 = tpu.concatenate %17, %18 in 1 : vector<4x367xf32>, vector<4x17xf32> -> vector<4x384xf32>
    %20 = vector.extract_strided_slice %1 {offsets = [0, 18], sizes = [4, 366], strides = [1, 1]} : vector<4x384xf32> to vector<4x366xf32>
    %21 = vector.extract_strided_slice %1 {offsets = [0, 0], sizes = [4, 18], strides = [1, 1]} : vector<4x384xf32> to vector<4x18xf32>
    %22 = tpu.concatenate %20, %21 in 1 : vector<4x366xf32>, vector<4x18xf32> -> vector<4x384xf32>
    %23 = vector.extract_strided_slice %1 {offsets = [0, 19], sizes = [4, 365], strides = [1, 1]} : vector<4x384xf32> to vector<4x365xf32>
    %24 = vector.extract_strided_slice %1 {offsets = [0, 0], sizes = [4, 19], strides = [1, 1]} : vector<4x384xf32> to vector<4x19xf32>
    %25 = tpu.concatenate %23, %24 in 1 : vector<4x365xf32>, vector<4x19xf32> -> vector<4x384xf32>
    %26 = tpu.concatenate %4, %7, %10, %13, %1, %16, %19, %22, %25 in 0 : vector<4x384xf32>, vector<4x384xf32>, vector<4x384xf32>, vector<4x384xf32>, vector<4x384xf32>, vector<4x384xf32>, vector<4x384xf32>, vector<4x384xf32>, vector<4x384xf32> -> vector<36x384xf32>
    %c0_2 = arith.constant 0 : index
    %c0_3 = arith.constant 0 : index
    %27 = vector.load %arg2[%c0_2, %c0_3] : memref<2x36xf32, #tpu.memory_space<vmem>>, vector<2x36xf32>
    %cst = arith.constant dense<0.000000e+00> : vector<2x384xf32>
    %28 = tpu.matmul %27, %26, %cst {dimension_numbers = #tpu.dot_dimension_numbers<[1], [0], [0], [1], [0, 0, 1, 1], [], []>} : vector<2x36xf32>, vector<36x384xf32>, vector<2x384xf32> -> vector<2x384xf32>
    %c0_4 = arith.constant 0 : index
    %c0_5 = arith.constant 0 : index
    %29 = vector.load %arg3[%c0_4, %c0_5] : memref<2x1xf32, #tpu.memory_space<vmem>>, vector<2x1xf32>
    %30 = vector.broadcast %29 : vector<2x1xf32> to vector<2x384xf32>
    %31 = arith.addf %28, %30 : vector<2x384xf32>
    %32 = arith.negf %31 : vector<2x384xf32>
    %33 = math.exp %32 : vector<2x384xf32>
    %cst_6 = arith.constant 1.000000e+00 : f32
    %34 = vector.broadcast %cst_6 : f32 to vector<2x384xf32>
    %35 = arith.addf %34, %33 : vector<2x384xf32>
    %36 = arith.divf %34, %35 : vector<2x384xf32>
    %37 = arith.mulf %31, %36 : vector<2x384xf32>
    %c0_7 = arith.constant 0 : index
    %c0_8 = arith.constant 0 : index
    %38 = vector.load %arg6[%c0_7, %c0_8] : memref<1x384xf32, #tpu.memory_space<vmem>>, vector<1x384xf32>
    %39 = vector.broadcast %38 : vector<1x384xf32> to vector<2x384xf32>
    %40 = arith.mulf %37, %39 : vector<2x384xf32>
    %41 = vector.extract_strided_slice %40 {offsets = [0, 365], sizes = [2, 19], strides = [1, 1]} : vector<2x384xf32> to vector<2x19xf32>
    %42 = vector.extract_strided_slice %40 {offsets = [0, 0], sizes = [2, 365], strides = [1, 1]} : vector<2x384xf32> to vector<2x365xf32>
    %43 = tpu.concatenate %41, %42 in 1 : vector<2x19xf32>, vector<2x365xf32> -> vector<2x384xf32>
    %44 = vector.extract_strided_slice %40 {offsets = [0, 366], sizes = [2, 18], strides = [1, 1]} : vector<2x384xf32> to vector<2x18xf32>
    %45 = vector.extract_strided_slice %40 {offsets = [0, 0], sizes = [2, 366], strides = [1, 1]} : vector<2x384xf32> to vector<2x366xf32>
    %46 = tpu.concatenate %44, %45 in 1 : vector<2x18xf32>, vector<2x366xf32> -> vector<2x384xf32>
    %47 = vector.extract_strided_slice %40 {offsets = [0, 367], sizes = [2, 17], strides = [1, 1]} : vector<2x384xf32> to vector<2x17xf32>
    %48 = vector.extract_strided_slice %40 {offsets = [0, 0], sizes = [2, 367], strides = [1, 1]} : vector<2x384xf32> to vector<2x367xf32>
    %49 = tpu.concatenate %47, %48 in 1 : vector<2x17xf32>, vector<2x367xf32> -> vector<2x384xf32>
    %50 = vector.extract_strided_slice %40 {offsets = [0, 383], sizes = [2, 1], strides = [1, 1]} : vector<2x384xf32> to vector<2x1xf32>
    %51 = vector.extract_strided_slice %40 {offsets = [0, 0], sizes = [2, 383], strides = [1, 1]} : vector<2x384xf32> to vector<2x383xf32>
    %52 = tpu.concatenate %50, %51 in 1 : vector<2x1xf32>, vector<2x383xf32> -> vector<2x384xf32>
    %53 = vector.extract_strided_slice %40 {offsets = [0, 1], sizes = [2, 383], strides = [1, 1]} : vector<2x384xf32> to vector<2x383xf32>
    %54 = vector.extract_strided_slice %40 {offsets = [0, 0], sizes = [2, 1], strides = [1, 1]} : vector<2x384xf32> to vector<2x1xf32>
    %55 = tpu.concatenate %53, %54 in 1 : vector<2x383xf32>, vector<2x1xf32> -> vector<2x384xf32>
    %56 = vector.extract_strided_slice %40 {offsets = [0, 17], sizes = [2, 367], strides = [1, 1]} : vector<2x384xf32> to vector<2x367xf32>
    %57 = vector.extract_strided_slice %40 {offsets = [0, 0], sizes = [2, 17], strides = [1, 1]} : vector<2x384xf32> to vector<2x17xf32>
    %58 = tpu.concatenate %56, %57 in 1 : vector<2x367xf32>, vector<2x17xf32> -> vector<2x384xf32>
    %59 = vector.extract_strided_slice %40 {offsets = [0, 18], sizes = [2, 366], strides = [1, 1]} : vector<2x384xf32> to vector<2x366xf32>
    %60 = vector.extract_strided_slice %40 {offsets = [0, 0], sizes = [2, 18], strides = [1, 1]} : vector<2x384xf32> to vector<2x18xf32>
    %61 = tpu.concatenate %59, %60 in 1 : vector<2x366xf32>, vector<2x18xf32> -> vector<2x384xf32>
    %62 = vector.extract_strided_slice %40 {offsets = [0, 19], sizes = [2, 365], strides = [1, 1]} : vector<2x384xf32> to vector<2x365xf32>
    %63 = vector.extract_strided_slice %40 {offsets = [0, 0], sizes = [2, 19], strides = [1, 1]} : vector<2x384xf32> to vector<2x19xf32>
    %64 = tpu.concatenate %62, %63 in 1 : vector<2x365xf32>, vector<2x19xf32> -> vector<2x384xf32>
    %65 = tpu.concatenate %43, %46, %49, %52, %40, %55, %58, %61, %64 in 0 : vector<2x384xf32>, vector<2x384xf32>, vector<2x384xf32>, vector<2x384xf32>, vector<2x384xf32>, vector<2x384xf32>, vector<2x384xf32>, vector<2x384xf32>, vector<2x384xf32> -> vector<18x384xf32>
    %c0_9 = arith.constant 0 : index
    %c0_10 = arith.constant 0 : index
    %66 = vector.load %arg4[%c0_9, %c0_10] : memref<4x18xf32, #tpu.memory_space<vmem>>, vector<4x18xf32>
    %cst_11 = arith.constant dense<0.000000e+00> : vector<4x384xf32>
    %67 = tpu.matmul %66, %65, %cst_11 {dimension_numbers = #tpu.dot_dimension_numbers<[1], [0], [0], [1], [0, 0, 1, 1], [], []>} : vector<4x18xf32>, vector<18x384xf32>, vector<4x384xf32> -> vector<4x384xf32>
    %c0_12 = arith.constant 0 : index
    %c0_13 = arith.constant 0 : index
    %68 = vector.load %arg5[%c0_12, %c0_13] : memref<4x1xf32, #tpu.memory_space<vmem>>, vector<4x1xf32>
    %69 = vector.broadcast %68 : vector<4x1xf32> to vector<4x384xf32>
    %70 = arith.addf %67, %69 : vector<4x384xf32>
    %71 = arith.negf %70 : vector<4x384xf32>
    %72 = math.exp %71 : vector<4x384xf32>
    %cst_14 = arith.constant 1.000000e+00 : f32
    %73 = vector.broadcast %cst_14 : f32 to vector<4x384xf32>
    %74 = arith.addf %73, %72 : vector<4x384xf32>
    %75 = arith.divf %73, %74 : vector<4x384xf32>
    %76 = arith.mulf %70, %75 : vector<4x384xf32>
    %77 = arith.addf %76, %1 : vector<4x384xf32>
    %c0_15 = arith.constant 0 : index
    %c0_16 = arith.constant 0 : index
    %c0_17 = arith.constant 0 : index
    %78 = vector.load %arg7[%c0_15, %c0_16, %c0_17] : memref<1x4x384xf32, #tpu.memory_space<vmem>>, vector<1x4x384xf32>
    %79 = vector.shape_cast %78 : vector<1x4x384xf32> to vector<4x384xf32>
    %80 = vector.shape_cast %77 : vector<4x384xf32> to vector<1x4x384xf32>
    tpu.vector_store %arg7[%c0_15, %c0_16, %c0_17], %80 {strides = array<i32>} : memref<1x4x384xf32, #tpu.memory_space<vmem>>, vector<1x4x384xf32>,
    return
  }
  func.func @transform_0(%arg0: i32) -> (i32, i32, i32) {
    %c0_i32 = arith.constant 0 : i32
    %c0_i32_0 = arith.constant 0 : i32
    %c0_i32_1 = arith.constant 0 : i32
    return %arg0, %c0_i32, %c0_i32_0 : i32, i32, i32
  }
  func.func @transform_1(%arg0: i32) -> (i32, i32) {
    %c0_i32 = arith.constant 0 : i32
    %c0_i32_0 = arith.constant 0 : i32
    %c0_i32_1 = arith.constant 0 : i32
    return %c0_i32, %c0_i32_0 : i32, i32
  }
  func.func @transform_2(%arg0: i32) -> (i32, i32) {
    %c0_i32 = arith.constant 0 : i32
    %c0_i32_0 = arith.constant 0 : i32
    %c0_i32_1 = arith.constant 0 : i32
    return %c0_i32, %c0_i32_0 : i32, i32
  }
  func.func @transform_3(%arg0: i32) -> (i32, i32) {
    %c0_i32 = arith.constant 0 : i32
    %c0_i32_0 = arith.constant 0 : i32
    %c0_i32_1 = arith.constant 0 : i32
    return %c0_i32, %c0_i32_0 : i32, i32
  }
  func.func @transform_4(%arg0: i32) -> (i32, i32) {
    %c0_i32 = arith.constant 0 : i32
    %c0_i32_0 = arith.constant 0 : i32
    %c0_i32_1 = arith.constant 0 : i32
    return %c0_i32, %c0_i32_0 : i32, i32
  }
  func.func @transform_5(%arg0: i32) -> (i32, i32) {
    %c0_i32 = arith.constant 0 : i32
    %c0_i32_0 = arith.constant 0 : i32
    %c0_i32_1 = arith.constant 0 : i32
    return %c0_i32, %c0_i32_0 : i32, i32
  }
  func.func @transform_6(%arg0: i32) -> (i32, i32, i32) {
    %c0_i32 = arith.constant 0 : i32
    %c0_i32_0 = arith.constant 0 : i32
    %c0_i32_1 = arith.constant 0 : i32
    return %arg0, %c0_i32, %c0_i32_0 : i32, i32, i32
  }
}

</mosaic_0001>

<bundles_post_ra>
// kernel: tpu_custom_call.1
= control target key start
LH: loop header
LB: loop body
LE: loop exit
PB: predicated region body
PF: predicated region fallthrough
CT: control target
= control target key end

     0   :  { %11 = vsyncpa [#allocation3], 0  ;;  %s1784_s0 = inlined_call_operand.hbm [shape: f32[2,4,384], index: 0, kind: input, shape index: {}]   ;;  %s1785_s1 = inlined_call_operand.vmem [shape: f32[2,36], index: 1, kind: input, shape index: {}]   ;;  %s1786_s2 = inlined_call_operand.vmem [shape: f32[2,1], index: 2, kind: input, shape index: {}]   ;;  %s1787_s3 = inlined_call_operand.vmem [shape: f32[4,18], index: 3, kind: input, shape index: {}]   ;;  %s1788_s4 = inlined_call_operand.vmem [shape: f32[4,1], index: 4, kind: input, shape index: {}]   ;;  %s1789_s5 = inlined_call_operand.vmem [shape: f32[1,384], index: 5, kind: input, shape index: {}]   ;;  %s1790_s6 = inlined_call_operand.hbm [shape: f32[2,4,384], index: 6, kind: output, shape index: {}]  }
   0x1   :  { %13 = vsyncpa [#allocation3 + $0x1], 0 }
   0x2   :  { %14 = vsyncpa [#allocation4], 0 }
   0x3   :  { %16 = vsyncpa [#allocation4 + $0x1], 0  ;;  %s1428_s21 = smov 0   ;;  %s1430_s22 = smov 0  }
   0x4   :  { %s1432_s23 = smov 0   ;;  %s1434_s24 = smov 0  }
   0x5 LB: > { %s1449_s25 = sadd.s32 4294967295, %s1377_s24   ;;  %s1045_s26 = sadd.s32 4294967294, %s1377_s24   ;;  %s1377_s24 = sphi %s1434_s24, %s1804_s24   ;;  %s1373_s23 = sphi %s1432_s23, %s1803_s23   ;;  %s1369_s22 = sphi %s1430_s22, %s1802_s22   ;;  %s1365_s21 = sphi %s1428_s21, %s1801_s21  }
   0x6   : > { %s1453_s27 = sadd.s32 1, %s1377_s24   ;;  %s29_s28 = sadd.s32 1, %s1373_s23 }
   0x7   : > { %s26_s29 = ssub.s32 %s1377_s24, %s1453_s27  ;;  %p36_p0 = scmp.ne.s32.totalorder %s1373_s23, %s1369_s22 }
   0x8   : > { %p27_p1 = scmp.eq.s32.totalorder %s26_s29, 0  ;;  %p37_p2 = scmp.eq.s32.totalorder %s1377_s24, 0 }
   0x9   : > { %p42_p3 = scmp.ne.s32.totalorder %s1369_s22, %s1365_s21  ;;  %p43_p4 = scmp.eq.s32.totalorder %s1449_s25, 0 }
   0xa   : > { %s1465_s30 = scalar_select %p27_p1, %s1373_s23, %s29_s28  }
   0xb   : > { %p38_p5 = por %p37_p2, %p36_p0  ;;  %p1467_p6 = por %p43_p4, %p42_p3 }
   0xc   : > { %p171_p7 = scmp.eq.s32.totalorder %s1449_s25, 1  ;;  %p177_p8 = scmp.eq.s32.totalorder %s1045_s26, 1 }
   0xd   : > { %p1138_p10 = scmp.lt.s32.totalorder %s1377_s24, 2  ;;  %s212_s10 = sand.u32 1, %s1373_s23  }
   0xe   : > { %p1474_p11 = por %p171_p7, %p36_p0  ;;  %p1478_p12 = por %p177_p8, %p42_p3 }
   0xf   : > { %s1123_s11 = smul.u32 192, %s1377_s24  ;;  %p1489_p13 = pnand %p1138_p10, %p38_p5 }
  0x10   : > { %s1793_s8 = scalar_select %p1474_p11, 1, 0 }
  0x11   : > { %s1794_s9 = scalar_select %p1478_p12, 1, 0 }
  0x12   : > { %s1122_s12 = smul.u32 12, %s212_s10  ;;  %s1487_s15 = scalar_lea.hbm %s1784_s0, %s1123_s11 }
  0x13   : > { %s213_s19 = scalar_lea.sflag [#allocation3], %s212_s10  ;;  %s1281_s20 = scalar_lea.hbm %s1487_s15, 192 }
  0x14   : > { %s216_s17 = scalar_lea.vmem [#allocation2], %s1122_s12  ;;  %p1282_p2 = scmp.ne.s32.totalorder %s1487_s15, %s1281_s20 }
  0x15   : > { %s224_s18 = sshll.u32 %s216_s17, 4  ;;  %p1283_p3 = pneg %p1489_p13  ;;  %s1494_s18 = int_to_ptr.vmem [resolvable:$true] %s224_s18 }
  0x16   : > { %s1286_s29 = scalar_lea.hbm %s1784_s0, 384  ;;  %p1287_p7 = scmp.lt.u32.totalorder %s1487_s15, %s1784_s0 }
  0x17   : > { %p1284_p4 = pnand %p1283_p3, %p1282_p2  ;;  %p1288_p8 = scmp.lt.u32.totalorder %s1286_s29, %s1281_s20 }
  0x18   : > { %p1290_p9 = scmp.lt.u32.totalorder %s1281_s20, %s1487_s15 }
  0x19   : > { %p1285_p5 = pneg %p1284_p4  ;;  %p1289_p10 = por %p1288_p8, %p1287_p7 }
  0x1b   : > { %p1291_p0 = por %p1290_p9, %p1289_p10 }
  0x1d   : > { %p1292_p1 = pnand %p1291_p0, %p1285_p5 }
  0x1f   : > { %1295 = shalt.err (!%p1292_p1)
}
  0x20   : > { %s1296_s10 = scalar_lea.vmem %s1494_s18, 192  ;;  %s1379_s12 = smov [#allocation2]  }
  0x21   : > { %p1297_p2 = scmp.ne.s32.totalorder %s1494_s18, %s1296_s10  ;;  %s1301_s14 = sshll.u32 %s1379_s12, 4  ;;  %s1302_s14 = int_to_ptr.vmem [resolvable:$false] %s1301_s14 }
  0x22   : > { %s1303_s17 = scalar_lea.vmem %s1302_s14, 384  ;;  %p1304_p11 = scmp.lt.s32.totalorder %s1494_s18, %s1302_s14 }
  0x23   : > { %p1299_p4 = pnand %p1297_p2, %p1283_p3  ;;  %p1305_p7 = scmp.lt.s32.totalorder %s1303_s17, %s1296_s10 }
  0x25   : > { %p1300_p12 = pneg %p1299_p4  ;;  %p1306_p8 = por %p1305_p7, %p1304_p11 }
  0x27   : > { %p1307_p9 = pnand %p1306_p8, %p1300_p12 }
  0x29   : > { %1310 = shalt.err (!%p1307_p9)
}
  0x2a   : > { %1133 = dma.hbm_to_vmem [thread:$0]  (!%p1489_p13), %s1487_s15, 192, %s1494_s18, %s213_s19  }
  0x2b   : > { %p1796_p0 = scmp.lt.s32.totalorder %s1377_s24, 3  ;;  %p1797_p1 = scmp.ge.s32.totalorder %s1377_s24, 1 }
  0x2d   : > { %p230_p3 = pnand %p1797_p1, %p1796_p0 }
  0x2e   : > { %s1527_s20 = sand.u32 (!%p230_p3), 1, %s1369_s22  }
  0x2f   : > { %233 = sbr.rel (%p230_p3) target bundleno = 867 (0x363), region = 44  ;;  %s236_s28 = scalar_lea.sflag (!%p230_p3), [#allocation3], %s1527_s20 }
  0x30   : > { %s1124_s26 = smul.u32 (!%p230_p3), 12, %s1527_s20 }
  0x32   : > { %s239_s16 = scalar_lea.vmem (!%p230_p3), [#allocation2], %s1124_s26 }
  0x36   : > { %1356 = dma.done.wait (%p1467_p6), %s236_s28, 192  }
  0x37   : > { %1358 = vsyncadd (%p1467_p6), %s236_s28, 4294967104  ;;  %v1537_v0 = vld [vmem:[%s239_s16 + $0x8] sm:$0xf]  ;;  %v1539_v1 = vld [vmem:[%s239_s16] sm:$0xff]  ;;  %s1380_s15 = smov 18   ;;  %s1381_s18 = smov 1  }
  0x38   : > { %287 = vrot.lane.b32.xlu1 %v1537_v0, %s1380_s15  ;;  %v1545_v2 = vcombine.high %v1539_v1, %v1539_v1  ;;  %v1382_v4 = vmov 0.0|0.0   ;;  %s1383_s7 = smov 17   ;;  %s1384_s19 = smov 19   ;;  %vm1388_vm0 = vmmov 0   ;;  %v1389_v6 = vmov 0.0  }
  0x39   : > { %1109 = vmatprep.subr.bf16.mxu1 %v1382_v4  ;;  %s1385_s29 = smov 110   ;;  %s1386_s11 = smov 127   ;;  %1089 = vmatprep.mubr.msk.f32.mxu1 %vm1388_vm0, %v1389_v6  ;;  %v1391_v7 = vmov 0   ;;  %v418_v8 = vld [vmem:[%s1786_s2] sm:$0x3]  ;;  %vm294_vm1 = vcmask 146432  }
  0x3a   : > { %v1184_v3 = vpack.i.bf16 %v1545_v2, %v1539_v1  ;;  %v1209_v5 = vpack.i.bf16 %v1537_v0, %v1545_v2  ;;  %s1387_s13 = smov 111   ;;  %499 = vmatprep.mubr.f32.mxu0 %v1389_v6  ;;  %s1390_s10 = smov 109   ;;  %1219 = vset.pattern.permute.xlu1 %v1391_v7  ;;  %vm320_vm2 = vcmask 7168   ;;  %vm306_vm3 = vcmask 138240  }
  0x3b   : > { %1255 = vset.pattern.permute.xlu0 %v1391_v7  ;;  %vm280_vm4 = vcmask 154624   ;;  %vm404_vm5 = vcmask 1043456   ;;  %vm331_vm6 = vcmask 1039360   ;;  %vm357_vm7 = vcmask 900096   ;;  %p1798_p11 = scmp.ne.s32.totalorder %s1793_s8, 0 }
  0x3c   : > { %313 = vrot.lane.b32.xlu1 %v1537_v0, %s1381_s18  ;;  %1185 = vrot.lane.b32.xlu0 %v1184_v3, %s1380_s15  ;;  %vm343_vm8 = vcmask 908288   ;;  %vm369_vm9 = vcmask 891904   ;;  %vm424_vm10 = vcmask 293888   ;;  %vm752_vm11 = vcmask 1041408  }
  0x3d   : > { %vm759_vm12 = vcmask 1045504  }
  0x40   : > { %1200 = vrot.lane.b32.xlu1 %v1184_v3, %s1383_s7  ;;  %1190 = vrot.lane.b32.xlu0 %v1184_v3, %s1381_s18 }
  0x44   : > { %299 = vrot.lane.b32.xlu1 %v1537_v0, %s1383_s7  ;;  %1195 = vrot.lane.b32.xlu0 %v1184_v3, %s1384_s19 }
  0x48   : > { %271 = vrot.lane.b32.xlu0 %v1537_v0, %s1384_s19  ;;  %1210 = vrot.lane.b32.xlu1 %v1209_v5, %s1385_s29 }
  0x4c   : > { %1205 = vrot.lane.b32.xlu0 %v1209_v5, %s1386_s11  ;;  %351 = vrot.lane.b32.xlu1 %v1539_v1, %s1385_s29 }
  0x50   : > { %325 = vrot.lane.b32.xlu0 %v1539_v1, %s1386_s11  ;;  %337 = vrot.lane.b32.xlu1 %v1539_v1, %s1387_s13 }
  0x54   : > { %1215 = vrot.lane.b32.xlu0 %v1209_v5, %s1387_s13  ;;  %367 = vrot.lane.b32.xlu1 %v1537_v0, %s1390_s10 }
  0x58   : > { %365 = vrot.lane.b32.xlu0 %v1545_v2, %s1390_s10  ;;  %421 = vperm.xlu1 %1219, %v418_v8  }
  0x5c   : > { %363 = vrot.lane.b32.xlu0 %v1539_v1, %s1390_s10 }
  0xaa   : > { %v288_v9 = vpop.permute.xlu1 %287 }
  0xae   : > { %v314_v10 = vpop.permute.xlu1 %313  ;;  %v1186_v11 = vpop.permute.xlu0 %1185 }
  0xaf   : > { %v1188_v12 = vunpack.i.h.bf16 %v1186_v11  ;;  %v1187_v13 = vunpack.i.l.bf16 %v1186_v11 }
  0xb1   : > { %v295_v22 = vsel %vm294_vm1, %v1187_v13, %v1188_v12  ;;  %v296_v24 = vsel %vm294_vm1, %v1188_v12, %v288_v9  ;;  %v298_v28 = vsel %vm294_vm1, %v288_v9, %v1187_v13 }
  0xb2   : > { %v1201_v14 = vpop.permute.xlu1 %1200  ;;  %v1191_v15 = vpop.permute.xlu0 %1190  ;;  %v377_v34 = vrot.slane %v295_v22, 4  ;;  %v378_v38 = vrot.slane %v296_v24, 4  ;;  %v376_v39 = vrot.slane %v298_v28, 4 }
  0xb3   : > { %v1203_v16 = vunpack.i.h.bf16 %v1201_v14  ;;  %v1202_v17 = vunpack.i.l.bf16 %v1201_v14  ;;  %v1193_v18 = vunpack.i.h.bf16 %v1191_v15  ;;  %v1192_v19 = vunpack.i.l.bf16 %v1191_v15 }
  0xb5   : > { %v322_v20 = vsel %vm320_vm2, %v1193_v18, %v314_v10  ;;  %v324_v21 = vsel %vm320_vm2, %v314_v10, %v1192_v19  ;;  %v321_v23 = vsel %vm320_vm2, %v1192_v19, %v1193_v18  ;;  %v307_v31 = vsel %vm306_vm3, %v1202_v17, %v1203_v16 }
  0xb6   : > { %v300_v25 = vpop.permute.xlu1 %299  ;;  %v1196_v26 = vpop.permute.xlu0 %1195  ;;  %v384_v27 = vrot.slane %v321_v23, 4  ;;  %v385_v32 = vrot.slane %v322_v20, 4  ;;  %v383_v33 = vrot.slane %v324_v21, 4 }
  0xb7   : > { %v1198_v29 = vunpack.i.h.bf16 %v1196_v26  ;;  %v1197_v30 = vunpack.i.l.bf16 %v1196_v26  ;;  %v308_v35 = vsel %vm306_vm3, %v1203_v16, %v300_v25  ;;  %v312_v36 = vsel %vm306_vm3, %v300_v25, %v1202_v17 }
  0xb8   : > { %v409_v42 = vsel %vm404_vm5, %v307_v31, %v384_v27  ;;  %v408_v48 = vsel %vm404_vm5, %v312_v36, %v383_v33  ;;  %v410_v50 = vsel %vm404_vm5, %v308_v35, %v385_v32 }
  0xb9   : > { %v281_v37 = vsel %vm280_vm4, %v1197_v30, %v1198_v29 }
  0xba   : > { %v272_v40 = vpop.permute.xlu0 %271  ;;  %v406_v41 = vsel %vm404_vm5, %v281_v37, %v377_v34  ;;  %v1211_v43 = vpop.permute.xlu1 %1210  ;;  %v417_v34 = vld [vmem:[%s1785_s1] sm:$0x3] }
  0xbb   : > { %v282_v44 = vsel %vm280_vm4, %v1198_v29, %v272_v40  ;;  %v286_v45 = vsel %vm280_vm4, %v272_v40, %v1197_v30  ;;  %v1101_v46 = vpack.c.bf16 %v409_v42, %v406_v41  ;;  %v1213_v57 = vunpack.i.h.bf16 %v1211_v43 }
  0xbc   : > { %v405_v47 = vsel %vm404_vm5, %v286_v45, %v376_v39  ;;  %v407_v49 = vsel %vm404_vm5, %v282_v44, %v378_v38  ;;  %v1212_v58 = vunpack.i.l.bf16 %v1211_v43 }
  0xbd   : > { %1102 = vmatprep.subr.bf16.mxu0 %v1101_v46  ;;  %v1103_v51 = vpack.c.bf16 %v408_v48, %v405_v47  ;;  %v1110_v52 = vpack.c.bf16 %v410_v50, %v407_v49  ;;  %v599_v47 = vlaneseq }
  0xbe   : > { %v1206_v53 = vpop.permute.xlu0 %1205  ;;  %v352_v56 = vpop.permute.xlu1 %351  ;;  %v359_v3 = vsel %vm357_vm7, %v1212_v58, %v1213_v57 }
  0xbf   : > { %v1208_v54 = vunpack.i.h.bf16 %v1206_v53  ;;  %v1207_v55 = vunpack.i.l.bf16 %v1206_v53  ;;  %1104 = vmatpush1.bf16.msra.mxu0 %v1103_v51  ;;  %1111 = vmatpush3.bf16.msra.mxu1 %v1110_v52  ;;  %v358_v5 = vsel %vm357_vm7, %v352_v56, %v1212_v58  ;;  %v362_v7 = vsel %vm357_vm7, %v1213_v57, %v352_v56 }
  0xc0   : > { %1112 = vmatprep.subr.bf16.mxu1 %v1382_v4  ;;  %v399_v14 = vrot.slane %v359_v3, 4  ;;  %v398_v15 = vrot.slane %v358_v5, 4  ;;  %v400_v16 = vrot.slane %v362_v7, 4  ;;  %v600_v53 = vshrl.u32 %v599_v47, 7 }
  0xc1   : > { %v333_v59 = vsel %vm331_vm6, %v1207_v55, %v1208_v54 }
  0xc2   : > { %v326_v60 = vpop.permute.xlu0 %325  ;;  %v392_v63 = vrot.slane %v333_v59, 4  ;;  %v338_v9 = vpop.permute.xlu1 %337  ;;  %v601_v56 = vsub.s32 0, %v600_v53  ;;  %v605_v58 = vsub.s32 1, %v600_v53 }
  0xc3   : > { %v332_v61 = vsel %vm331_vm6, %v326_v60, %v1207_v55  ;;  %v336_v62 = vsel %vm331_vm6, %v1208_v54, %v326_v60  ;;  %v609_v54 = vsub.s32 2, %v600_v53  ;;  %v597_v55 = vld [vmem:[%s1789_s5] sm:$0x7] }
  0xc4   : > { %v393_v8 = vrot.slane %v336_v62, 4  ;;  %v391_v10 = vrot.slane %v332_v61, 4  ;;  %v412_v17 = vsel %vm404_vm5, %v1545_v2, %v392_v63  ;;  %v602_v63 = vrot.slane %v597_v55, %v601_v56 }
  0xc5   : > { %v610_v57 = vrot.slane %v597_v55, %v609_v54 }
  0xc6   : > { %v1216_v11 = vpop.permute.xlu0 %1215  ;;  %v413_v21 = vsel %vm404_vm5, %v1537_v0, %v393_v8  ;;  %v411_v26 = vsel %vm404_vm5, %v1539_v1, %v391_v10  ;;  %v368_v27 = vpop.permute.xlu1 %367  ;;  %v606_v8 = vrot.slane %v597_v55, %v605_v58 }
  0xc7   : > { %v1218_v12 = vunpack.i.h.bf16 %v1216_v11  ;;  %v1217_v13 = vunpack.i.l.bf16 %v1216_v11 }
  0xc9   : > { %v345_v18 = vsel %vm343_vm8, %v1217_v13, %v1218_v12  ;;  %v344_v19 = vsel %vm343_vm8, %v338_v9, %v1217_v13  ;;  %v350_v20 = vsel %vm343_vm8, %v1218_v12, %v338_v9  ;;  %v773_v13 = vld [vmem:[%s1788_s4] sm:$0xf] }
  0xca   : > { %v414_v22 = vsel %vm404_vm5, %v344_v19, %v398_v15  ;;  %v416_v23 = vsel %vm404_vm5, %v350_v20, %v400_v16  ;;  %v366_v24 = vpop.permute.xlu0 %365  ;;  %v415_v25 = vsel %vm404_vm5, %v345_v18, %v399_v14 }
  0xcb   : > { %v1105_v28 = vpack.c.bf16 %v415_v25, %v412_v17  ;;  %v1113_v29 = vpack.c.bf16 %v416_v23, %v413_v21  ;;  %v1107_v30 = vpack.c.bf16 %v414_v22, %v411_v26  ;;  %v371_v31 = vsel %vm369_vm9, %v366_v24, %v368_v27 }
  0xcd   : > { %1106 = vmatprep.subr.bf16.mxu0 %v1105_v28  ;;  %1114 = vmatpush3.bf16.msra.mxu1 %v1113_v29 }
  0xce   : > { %v364_v32 = vpop.permute.xlu0 %363  ;;  %1108 = vmatpush1.bf16.msra.mxu0 %v1107_v30  ;;  %1087 = vmatprep.subr.mxu1 %v1389_v6 }
  0xcf   : > { %v374_v33 = vsel %vm369_vm9, %v368_v27, %v364_v32  ;;  %1050 = vmatprep.subr.msk.mxu0 %vm404_vm5, %v371_v31  ;;  %v370_v35 = vsel %vm369_vm9, %v364_v32, %v366_v24 }
  0xd1   : > { %1088 = vmatpush3.msk.msra.mxu1 %vm404_vm5, %v374_v33 }
  0xd2   : > { %1051 = vmatpush1.msk.msra.mxu0 %vm404_vm5, %v370_v35  ;;  %1090 = vmatmul.mubr.msk.f32.vlgmr.msra.gmra.mrb[0].mxu1 %vm424_vm10, %v417_v34 }
  0xd3   : > { %1052 = vmatmul.mubr.msk.f32.vlgmr.msra.gmra.mrb[0].mxu0 %vm424_vm10, %v417_v34  ;;  %1119 = vmatprep.subr.bf16.mxu1 %v1382_v4 }
  0xd4   : > { %853 = vmatprep.mubr.f32.mxu0 %v1389_v6  ;;  %1098 = vmatprep.mubr.msk.f32.mxu1 %vm1388_vm0, %v1389_v6 }
  0xd7   : > { %v422_v36 = vpop.permute.xlu1 %421 }
 0x1a5   : > { %v572_v37 = vpop.f32.mrb[0].mxu1 }
 0x1a6   : > { %v573_v38 = vadd.f32 %v572_v37, %v422_v36  ;;  %v501_v39 = vpop.f32.mrb[0].mxu0  ;;  %v1091_v40 = vpop.f32.mrb[1].mxu1 }
 0x1a7   : > { %v502_v41 = vadd.f32 %v501_v39, %v422_v36  ;;  %v503_v42 = vpop.f32.mrb[1].mxu0 }
 0x1a8   : > { %v1057_v43 = vmul.f32 -1.442695, %v573_v38  ;;  %v504_v44 = vadd.f32 %v503_v42, %v422_v36 }
 0x1a9   : > { %v1055_v45 = vmul.f32 -1.442695, %v502_v41 }
 0x1aa   : > { %1257 = vpow2.f32 %v1057_v43  ;;  %v1056_v46 = vmul.f32 -1.442695, %v504_v44 }
 0x1ab   : > { %1259 = vpow2.f32 %v1055_v45 }
 0x1ac   : > { %1261 = vpow2.f32 %v1056_v46 }
 0x1b4   : > { %v1258_v4 = vpop.eup %1257 }
 0x1b5   : > { %v1260_v48 = vpop.eup %1259  ;;  %v587_v49 = vadd.f32 1.0, %v1258_v4 }
 0x1b6   : > { %v1262_v50 = vpop.eup %1261  ;;  %v585_v51 = vadd.f32 1.0, %v1260_v48 }
 0x1b7   : > { %1263 = vrcp.f32 %v587_v49  ;;  %v586_v52 = vadd.f32 1.0, %v1262_v50 }
 0x1b8   : > { %1265 = vrcp.f32 %v585_v51 }
 0x1b9   : > { %1267 = vrcp.f32 %v586_v52 }
 0x1c1   : > { %v1264_v59 = vpop.eup %1263 }
 0x1c2   : > { %v1266_v60 = vpop.eup %1265  ;;  %v596_v61 = vmul.f32 %v1264_v59, %v573_v38 }
 0x1c3   : > { %v1268_v62 = vpop.eup %1267  ;;  %v594_v5 = vmul.f32 %v1266_v60, %v502_v41 }
 0x1c4   : > { %v1637_v3 = vmul.f32 %v610_v57, %v596_v61  ;;  %v595_v7 = vmul.f32 %v1268_v62, %v504_v44 }
 0x1c5   : > { %v1643_v9 = vmul.f32 %v602_v63, %v594_v5 }
 0x1c6   : > { %644 = vrot.lane.b32.xlu1 %v1637_v3, %s1383_s7  ;;  %633 = vrot.lane.b32.xlu0 %v1637_v3, %s1380_s15  ;;  %v1645_v10 = vmul.f32 %v606_v8, %v595_v7 }
 0x1c8   : > { %v1220_v11 = vpack.i.bf16 %v1645_v10, %v1643_v9  ;;  %v1225_v12 = vpack.i.bf16 %v1637_v3, %v1645_v10 }
 0x1ca   : > { %618 = vrot.lane.b32.xlu1 %v1637_v3, %s1384_s19  ;;  %666 = vrot.lane.b32.xlu0 %v1643_v9, %s1386_s11 }
 0x1ce   : > { %677 = vrot.lane.b32.xlu1 %v1643_v9, %s1387_s13  ;;  %1221 = vrot.lane.b32.xlu0 %v1220_v11, %s1380_s15 }
 0x1d2   : > { %1226 = vrot.lane.b32.xlu1 %v1225_v12, %s1386_s11  ;;  %1241 = vrot.lane.b32.xlu0 %v1220_v11, %s1384_s19  ;;  %s267_s11 = scalar_lea.vmem [#allocation5], %s1124_s26  ;;  %s1392_s26 = smov [#allocation5]  }
 0x1d3   : > { %s1315_s16 = sshll.u32 %s1392_s26, 4  ;;  %s1316_s16 = int_to_ptr.vmem [resolvable:$false] %s1315_s16 }
 0x1d4   : > { %s1317_s12 = scalar_lea.vmem %s1316_s16, 384 }
 0x1d6   : > { %1231 = vrot.lane.b32.xlu1 %v1220_v11, %s1383_s7  ;;  %1246 = vrot.lane.b32.xlu0 %v1220_v11, %s1381_s18 }
 0x1da   : > { %1236 = vrot.lane.b32.xlu1 %v1225_v12, %s1387_s13  ;;  %1251 = vrot.lane.b32.xlu0 %v1225_v12, %s1385_s29  ;;  %s975_s13 = sshll.u32 %s267_s11, 4  ;;  %s1742_s13 = int_to_ptr.vmem [resolvable:$true] %s975_s13 }
 0x1db   : > { %s1311_s28 = scalar_lea.vmem %s1742_s13, 192  ;;  %p1318_p5 = scmp.lt.s32.totalorder %s1742_s13, %s1316_s16 }
 0x1dc   : > { %p1312_p6 = scmp.ne.s32.totalorder %s1742_s13, %s1311_s28  ;;  %p1319_p10 = scmp.lt.s32.totalorder %s1317_s12, %s1311_s28 }
 0x1de   : > { %688 = vrot.lane.b32.xlu1 %v1643_v9, %s1385_s29  ;;  %655 = vrot.lane.b32.xlu0 %v1637_v3, %s1381_s18  ;;  %s1125_s29 = smul.u32 192, %s1449_s25  ;;  %s961_s25 = scalar_lea.sflag [#allocation4], %s1527_s20 }
 0x1df   : > { %p1313_p12 = pnand %p1312_p6, %p1798_p11  ;;  %p1320_p2 = por %p1319_p10, %p1318_p5 }
 0x1e0   : > { %s1740_s17 = scalar_lea.hbm %s1790_s6, %s1125_s29 }
 0x1e1   : > { %p1314_p13 = pneg %p1313_p12 }
 0x1e2   : > { %703 = vrot.lane.b32.xlu1 %v1637_v3, %s1390_s10  ;;  %701 = vrot.lane.b32.xlu0 %v1645_v10, %s1390_s10 }
 0x1e3   : > { %p1321_p4 = pnand %p1320_p2, %p1314_p13 }
 0x1e6   : > { %776 = vperm.xlu1 %1219, %v773_v13   ;;  %699 = vrot.lane.b32.xlu0 %v1643_v9, %s1390_s10 }
 0x238   : > { %v645_v14 = vpop.permute.xlu1 %644  ;;  %v634_v15 = vpop.permute.xlu0 %633 }
 0x23c   : > { %v619_v16 = vpop.permute.xlu1 %618  ;;  %v667_v17 = vpop.permute.xlu0 %666 }
 0x240   : > { %v678_v18 = vpop.permute.xlu1 %677  ;;  %v1222_v19 = vpop.permute.xlu0 %1221 }
 0x241   : > { %v1224_v20 = vunpack.i.h.bf16 %v1222_v19  ;;  %v1223_v21 = vunpack.i.l.bf16 %v1222_v19 }
 0x243   : > { %v641_v22 = vsel %vm294_vm1, %v1224_v20, %v634_v15  ;;  %v640_v23 = vsel %vm294_vm1, %v1223_v21, %v1224_v20  ;;  %v643_v24 = vsel %vm294_vm1, %v634_v15, %v1223_v21 }
 0x244   : > { %v1227_v25 = vpop.permute.xlu1 %1226  ;;  %v1242_v26 = vpop.permute.xlu0 %1241  ;;  %v713_v31 = vrot.slane %v641_v22, 6  ;;  %v711_v32 = vrot.slane %v643_v24, 6  ;;  %v712_v36 = vrot.slane %v640_v23, 6 }
 0x245   : > { %v1229_v27 = vunpack.i.h.bf16 %v1227_v25  ;;  %v1228_v28 = vunpack.i.l.bf16 %v1227_v25  ;;  %v1244_v29 = vunpack.i.h.bf16 %v1242_v26  ;;  %v1243_v30 = vunpack.i.l.bf16 %v1242_v26 }
 0x247   : > { %v672_v33 = vsel %vm331_vm6, %v667_v17, %v1228_v28  ;;  %v673_v34 = vsel %vm331_vm6, %v1228_v28, %v1229_v27  ;;  %v676_v35 = vsel %vm331_vm6, %v1229_v27, %v667_v17  ;;  %v628_v38 = vsel %vm280_vm4, %v1244_v29, %v619_v16 }
 0x248   : > { %v732_v37 = vrot.slane %v672_v33, 6  ;;  %v627_v39 = vsel %vm280_vm4, %v1243_v30, %v1244_v29  ;;  %v1232_v40 = vpop.permute.xlu1 %1231  ;;  %v1247_v41 = vpop.permute.xlu0 %1246  ;;  %v733_v42 = vrot.slane %v673_v34, 6  ;;  %v734_v43 = vrot.slane %v676_v35, 6 }
 0x249   : > { %v632_v44 = vsel %vm280_vm4, %v619_v16, %v1243_v30  ;;  %v1234_v45 = vunpack.i.h.bf16 %v1232_v40  ;;  %v754_v46 = vsel %vm752_vm11, %v627_v39, %v712_v36  ;;  %v1233_v4 = vunpack.i.l.bf16 %v1232_v40 }
 0x24a   : > { %v1249_v47 = vunpack.i.h.bf16 %v1247_v41  ;;  %v1248_v48 = vunpack.i.l.bf16 %v1247_v41  ;;  %v753_v49 = vsel %vm752_vm11, %v632_v44, %v711_v32  ;;  %v755_v50 = vsel %vm752_vm11, %v628_v38, %v713_v31 }
 0x24b   : > { %v652_v51 = vsel %vm306_vm3, %v1234_v45, %v645_v14  ;;  %v763_v52 = vsel %vm752_vm11, %v1643_v9, %v732_v37  ;;  %v651_v54 = vsel %vm306_vm3, %v1233_v4, %v1234_v45  ;;  %v654_v55 = vsel %vm306_vm3, %v645_v14, %v1233_v4 }
 0x24c   : > { %v720_v53 = vrot.slane %v652_v51, 4  ;;  %v662_v56 = vsel %vm320_vm2, %v1248_v48, %v1249_v47  ;;  %v1237_v57 = vpop.permute.xlu1 %1236  ;;  %v1252_v58 = vpop.permute.xlu0 %1251  ;;  %v719_v59 = vrot.slane %v651_v54, 4  ;;  %v765_v61 = vsel %vm752_vm11, %v1637_v3, %v734_v43 }
 0x24d   : > { %v1239_v60 = vunpack.i.h.bf16 %v1237_v57  ;;  %v764_v62 = vsel %vm752_vm11, %v1645_v10, %v733_v42  ;;  %v718_v63 = vrot.slane %v654_v55, 4  ;;  %v1238_v5 = vunpack.i.l.bf16 %v1237_v57 }
 0x24e   : > { %v1254_v7 = vunpack.i.h.bf16 %v1252_v58  ;;  %v1253_v8 = vunpack.i.l.bf16 %v1252_v58  ;;  %v726_v9 = vrot.slane %v662_v56, 2  ;;  %v758_v12 = vsel %vm404_vm5, %v755_v50, %v720_v53 }
 0x24f   : > { %v687_v11 = vsel %vm343_vm8, %v1239_v60, %v678_v18  ;;  %v757_v13 = vsel %vm404_vm5, %v754_v46, %v719_v59  ;;  %v683_v15 = vsel %vm343_vm8, %v678_v18, %v1238_v5  ;;  %v684_v16 = vsel %vm343_vm8, %v1238_v5, %v1239_v60 }
 0x250   : > { %v741_v14 = vrot.slane %v687_v11, 4  ;;  %v695_v3 = vsel %vm357_vm7, %v1253_v8, %v1254_v7  ;;  %v689_v17 = vpop.permute.xlu1 %688  ;;  %v656_v10 = vpop.permute.xlu0 %655  ;;  %v739_v19 = vrot.slane %v683_v15, 4  ;;  %v740_v20 = vrot.slane %v684_v16, 4 }
 0x251   : > { %v747_v21 = vrot.slane %v695_v3, 2  ;;  %v694_v22 = vsel %vm357_vm7, %v689_v17, %v1253_v8  ;;  %v698_v23 = vsel %vm357_vm7, %v1254_v7, %v689_v17  ;;  %v663_v26 = vsel %vm320_vm2, %v1249_v47, %v656_v10  ;;  %v772_v47 = vld [vmem:[%s1787_s3] sm:$0xf] }
 0x252   : > { %v746_v24 = vrot.slane %v694_v22, 2  ;;  %v768_v25 = vsel %vm404_vm5, %v765_v61, %v741_v14  ;;  %v748_v27 = vrot.slane %v698_v23, 2  ;;  %v766_v18 = vsel %vm404_vm5, %v763_v52, %v739_v19 }
 0x253   : > { %v665_v28 = vsel %vm320_vm2, %v656_v10, %v1248_v48  ;;  %v727_v29 = vrot.slane %v663_v26, 2  ;;  %v756_v32 = vsel %vm404_vm5, %v753_v49, %v718_v63  ;;  %v767_v34 = vsel %vm404_vm5, %v764_v62, %v740_v20 }
 0x254   : > { %v769_v30 = vsel %vm759_vm12, %v766_v18, %v746_v24  ;;  %v725_v31 = vrot.slane %v665_v28, 2  ;;  %v702_v33 = vpop.permute.xlu0 %701  ;;  %v771_v35 = vsel %vm759_vm12, %v768_v25, %v748_v27  ;;  %v761_v37 = vsel %vm759_vm12, %v757_v13, %v726_v9  ;;  %v704_v40 = vpop.permute.xlu1 %703 }
 0x255   : > { %v762_v36 = vsel %vm759_vm12, %v758_v12, %v727_v29  ;;  %v770_v38 = vsel %vm759_vm12, %v767_v34, %v747_v21  ;;  %v706_v45 = vsel %vm369_vm9, %v702_v33, %v704_v40 }
 0x256   : > { %v760_v39 = vsel %vm759_vm12, %v756_v32, %v725_v31  ;;  %v1115_v41 = vpack.c.bf16 %v770_v38, %v761_v37  ;;  %v1120_v42 = vpack.c.bf16 %v771_v35, %v762_v36 }
 0x257   : > { %v1117_v43 = vpack.c.bf16 %v769_v30, %v760_v39 }
 0x258   : > { %1116 = vmatprep.subr.bf16.mxu0 %v1115_v41  ;;  %1121 = vmatpush3.bf16.msra.mxu1 %v1120_v42  ;;  %v700_v44 = vpop.permute.xlu0 %699 }
 0x259   : > { %1118 = vmatpush1.bf16.msra.mxu0 %v1117_v43  ;;  %v709_v46 = vsel %vm369_vm9, %v704_v40, %v700_v44  ;;  %1096 = vmatprep.subr.mxu1 %v1389_v6  ;;  %v705_v4 = vsel %vm369_vm9, %v700_v44, %v702_v33 }
 0x25a   : > { %1058 = vmatprep.subr.msk.mxu0 %vm752_vm11, %v706_v45 }
 0x25c   : > { %1097 = vmatpush3.msk.msra.mxu1 %vm752_vm11, %v709_v46 }
 0x25d   : > { %1059 = vmatpush1.msk.msra.mxu0 %vm752_vm11, %v705_v4  ;;  %1099 = vmatmul.mubr.msk.f32.vlgmr.msra.gmra.mrb[2].mxu1 %vm294_vm1, %v772_v47 }
 0x25e   : > { %1060 = vmatmul.mubr.msk.f32.vlgmr.msra.gmra.mrb[2].mxu0 %vm294_vm1, %v772_v47 }
 0x265   : > { %v777_v48 = vpop.permute.xlu1 %776 }
 0x330   : > { %v926_v49 = vpop.f32.mrb[2].mxu1 }
 0x331   : > { %v855_v50 = vpop.f32.mrb[2].mxu0  ;;  %v927_v6 = vadd.f32 %v926_v49, %v777_v48  ;;  %v1100_v51 = vpop.f32.mrb[3].mxu1 }
 0x332   : > { %v856_v52 = vadd.f32 %v855_v50, %v777_v48  ;;  %v857_v53 = vpop.f32.mrb[3].mxu0 }
 0x333   : > { %v1065_v54 = vmul.f32 -1.442695, %v927_v6  ;;  %v858_v55 = vadd.f32 %v857_v53, %v777_v48 }
 0x334   : > { %v1063_v56 = vmul.f32 -1.442695, %v856_v52 }
 0x335   : > { %1269 = vpow2.f32 %v1065_v54  ;;  %v1064_v57 = vmul.f32 -1.442695, %v858_v55 }
 0x336   : > { %1271 = vpow2.f32 %v1063_v56 }
 0x337   : > { %1273 = vpow2.f32 %v1064_v57 }
 0x33f   : > { %v1270_v58 = vpop.eup %1269 }
 0x340   : > { %v1272_v59 = vpop.eup %1271  ;;  %v941_v60 = vadd.f32 1.0, %v1270_v58 }
 0x341   : > { %v1274_v61 = vpop.eup %1273  ;;  %v939_v62 = vadd.f32 1.0, %v1272_v59 }
 0x342   : > { %1275 = vrcp.f32 %v941_v60  ;;  %v940_v63 = vadd.f32 1.0, %v1274_v61 }
 0x343   : > { %1277 = vrcp.f32 %v939_v62 }
 0x344   : > { %1279 = vrcp.f32 %v940_v63 }
 0x34c   : > { %v1276_v5 = vpop.eup %1275 }
 0x34d   : > { %v1278_v7 = vpop.eup %1277  ;;  %v950_v8 = vmul.f32 %v1276_v5, %v927_v6 }
 0x34e   : > { %v1280_v9 = vpop.eup %1279  ;;  %v948_v11 = vmul.f32 %v1278_v7, %v856_v52 }
 0x34f   : > { %v953_v12 = vadd.f32 %v950_v8, %v1537_v0  ;;  %v949_v13 = vmul.f32 %v1280_v9, %v858_v55 }
 0x350   : > { %v951_v14 = vadd.f32 %v948_v11, %v1539_v1 }
 0x351   : > { %v952_v15 = vadd.f32 %v949_v13, %v1545_v2  ;;  %959 = vst [vmem:[%s267_s11 + $0x8] sm:$0xf] %v953_v12 }
 0x353   : > { %v956_v16 = vcombine.low %v951_v14, %v952_v15 }
 0x355   : > { %958 = vst [vmem:[%s267_s11] sm:$0xff] %v956_v16 }
 0x356   : > { %1324 = shalt.err (!%p1321_p4)
}
 0x357   : > { %s1325_s20 = scalar_lea.hbm %s1740_s17, 192  ;;  %s1329_s18 = scalar_lea.hbm %s1790_s6, 384 }
 0x358   : > { %p1326_p7 = scmp.ne.s32.totalorder %s1740_s17, %s1325_s20  ;;  %p1330_p0 = scmp.lt.u32.totalorder %s1740_s17, %s1790_s6 }
 0x359   : > { %p1331_p1 = scmp.lt.u32.totalorder %s1329_s18, %s1325_s20  ;;  %p1333_p6 = scmp.lt.u32.totalorder %s1325_s20, %s1740_s17 }
 0x35a   : > { %p1327_p8 = pnand %p1326_p7, %p1798_p11 }
 0x35b   : > { %p1332_p3 = por %p1331_p1, %p1330_p0 }
 0x35c   : > { %p1328_p9 = pneg %p1327_p8 }
 0x35d   : > { %p1334_p12 = por %p1333_p6, %p1332_p3 }
 0x35f   : > { %p1335_p13 = pnand %p1334_p12, %p1328_p9 }
 0x361   : > { %1338 = shalt.err (!%p1335_p13)
}
 0x362   : > { %1128 = dma.vmem_to_hbm [thread:$0]  (%p1798_p11), %s1742_s13, 192, %s1740_s17, %s961_s25  }
 0x363 PF: > { %s987_s11 = sand.u32 1, %s1365_s21   ;;  %p1799_p5 = scmp.ne.s32.totalorder %s1794_s9, 0 }
 0x364   : > { %p1800_p10 = scmp.ge.s32.totalorder %s1377_s24, 2  ;;  %s988_s10 = scalar_lea.sflag [#allocation4], %s987_s11 }
 0x366   : > { %p1135_p2 = pnand %p1800_p10, %p1799_p5 }
 0x368   : > { %1360 = dma.done.wait (!%p1135_p2), %s988_s10, 192  }
 0x369   : > { %1362 = vsyncadd (!%p1135_p2), %s988_s10, 4294967104  ;;  %p19_p4 = scmp.ge.s32.totalorder %s1453_s27, 4   ;;  %s1801_s21 = smov %s1369_s22 }
 0x36a   : > { %s1802_s22 = smov %s1373_s23  ;;  %s1803_s23 = smov %s1465_s30 }
 0x36b   : > { %s1804_s24 = smov %s1453_s27  ;;  %21 = sbr.rel (!%p19_p4) target bundleno = 5 (0x5), region = 89 }
 0x372   :  { %993 = vsyncpa [#allocation3], 1 }
 0x373   :  { %995 = vsyncpa [#allocation3 + $0x1], 1 }
 0x374   :  { %996 = vsyncpa [#allocation4], 1 }
 0x375   :  { %998 = vsyncpa [#allocation4 + $0x1], 1 }

// kernel: tpu_custom_call.1
= control target key start
LH: loop header
LB: loop body
LE: loop exit
PB: predicated region body
PF: predicated region fallthrough
CT: control target
= control target key end

     0   :  { %11 = vsyncpa [#allocation3], 0  ;;  %s1784_s0 = inlined_call_operand.hbm [shape: f32[2,4,384], index: 0, kind: input, shape index: {}]   ;;  %s1785_s1 = inlined_call_operand.vmem [shape: f32[2,36], index: 1, kind: input, shape index: {}]   ;;  %s1786_s2 = inlined_call_operand.vmem [shape: f32[2,1], index: 2, kind: input, shape index: {}]   ;;  %s1787_s3 = inlined_call_operand.vmem [shape: f32[4,18], index: 3, kind: input, shape index: {}]   ;;  %s1788_s4 = inlined_call_operand.vmem [shape: f32[4,1], index: 4, kind: input, shape index: {}]   ;;  %s1789_s5 = inlined_call_operand.vmem [shape: f32[1,384], index: 5, kind: input, shape index: {}]   ;;  %s1790_s6 = inlined_call_operand.hbm [shape: f32[2,4,384], index: 6, kind: output, shape index: {}]  }
   0x1   :  { %13 = vsyncpa [#allocation3 + $0x1], 0 }
   0x2   :  { %14 = vsyncpa [#allocation4], 0 }
   0x3   :  { %16 = vsyncpa [#allocation4 + $0x1], 0  ;;  %s1428_s21 = smov 0   ;;  %s1430_s22 = smov 0  }
   0x4   :  { %s1432_s23 = smov 0   ;;  %s1434_s24 = smov 0  }
   0x5 LB: > { %s1449_s25 = sadd.s32 4294967295, %s1377_s24   ;;  %s1045_s26 = sadd.s32 4294967294, %s1377_s24   ;;  %s1377_s24 = sphi %s1434_s24, %s1804_s24   ;;  %s1373_s23 = sphi %s1432_s23, %s1803_s23   ;;  %s1369_s22 = sphi %s1430_s22, %s1802_s22   ;;  %s1365_s21 = sphi %s1428_s21, %s1801_s21  }
   0x6   : > { %s1453_s27 = sadd.s32 1, %s1377_s24   ;;  %s29_s28 = sadd.s32 1, %s1373_s23 }
   0x7   : > { %s26_s29 = ssub.s32 %s1377_s24, %s1453_s27  ;;  %p36_p0 = scmp.ne.s32.totalorder %s1373_s23, %s1369_s22 }
   0x8   : > { %p27_p1 = scmp.eq.s32.totalorder %s26_s29, 0  ;;  %p37_p2 = scmp.eq.s32.totalorder %s1377_s24, 0 }
   0x9   : > { %p42_p3 = scmp.ne.s32.totalorder %s1369_s22, %s1365_s21  ;;  %p43_p4 = scmp.eq.s32.totalorder %s1449_s25, 0 }
   0xa   : > { %s1465_s30 = scalar_select %p27_p1, %s1373_s23, %s29_s28  }
   0xb   : > { %p38_p5 = por %p37_p2, %p36_p0  ;;  %p1467_p6 = por %p43_p4, %p42_p3 }
   0xc   : > { %p171_p7 = scmp.eq.s32.totalorder %s1449_s25, 1  ;;  %p177_p8 = scmp.eq.s32.totalorder %s1045_s26, 1 }
   0xd   : > { %p1138_p10 = scmp.lt.s32.totalorder %s1377_s24, 2  ;;  %s212_s10 = sand.u32 1, %s1373_s23  }
   0xe   : > { %p1474_p11 = por %p171_p7, %p36_p0  ;;  %p1478_p12 = por %p177_p8, %p42_p3 }
   0xf   : > { %s1123_s11 = smul.u32 192, %s1377_s24  ;;  %p1489_p13 = pnand %p1138_p10, %p38_p5 }
  0x10   : > { %s1793_s8 = scalar_select %p1474_p11, 1, 0 }
  0x11   : > { %s1794_s9 = scalar_select %p1478_p12, 1, 0 }
  0x12   : > { %s1122_s12 = smul.u32 12, %s212_s10  ;;  %s1487_s15 = scalar_lea.hbm %s1784_s0, %s1123_s11 }
  0x13   : > { %s213_s19 = scalar_lea.sflag [#allocation3], %s212_s10  ;;  %s1281_s20 = scalar_lea.hbm %s1487_s15, 192 }
  0x14   : > { %s216_s17 = scalar_lea.vmem [#allocation2], %s1122_s12  ;;  %p1282_p2 = scmp.ne.s32.totalorder %s1487_s15, %s1281_s20 }
  0x15   : > { %s224_s18 = sshll.u32 %s216_s17, 4  ;;  %p1283_p3 = pneg %p1489_p13  ;;  %s1494_s18 = int_to_ptr.vmem [resolvable:$true] %s224_s18 }
  0x16   : > { %s1286_s29 = scalar_lea.hbm %s1784_s0, 384  ;;  %p1287_p7 = scmp.lt.u32.totalorder %s1487_s15, %s1784_s0 }
  0x17   : > { %p1284_p4 = pnand %p1283_p3, %p1282_p2  ;;  %p1288_p8 = scmp.lt.u32.totalorder %s1286_s29, %s1281_s20 }
  0x18   : > { %p1290_p9 = scmp.lt.u32.totalorder %s1281_s20, %s1487_s15 }
  0x19   : > { %p1285_p5 = pneg %p1284_p4  ;;  %p1289_p10 = por %p1288_p8, %p1287_p7 }
  0x1b   : > { %p1291_p0 = por %p1290_p9, %p1289_p10 }
  0x1d   : > { %p1292_p1 = pnand %p1291_p0, %p1285_p5 }
  0x1f   : > { %1295 = shalt.err (!%p1292_p1)
}
  0x20   : > { %s1296_s10 = scalar_lea.vmem %s1494_s18, 192  ;;  %s1379_s12 = smov [#allocation2]  }
  0x21   : > { %p1297_p2 = scmp.ne.s32.totalorder %s1494_s18, %s1296_s10  ;;  %s1301_s14 = sshll.u32 %s1379_s12, 4  ;;  %s1302_s14 = int_to_ptr.vmem [resolvable:$false] %s1301_s14 }
  0x22   : > { %s1303_s17 = scalar_lea.vmem %s1302_s14, 384  ;;  %p1304_p11 = scmp.lt.s32.totalorder %s1494_s18, %s1302_s14 }
  0x23   : > { %p1299_p4 = pnand %p1297_p2, %p1283_p3  ;;  %p1305_p7 = scmp.lt.s32.totalorder %s1303_s17, %s1296_s10 }
  0x25   : > { %p1300_p12 = pneg %p1299_p4  ;;  %p1306_p8 = por %p1305_p7, %p1304_p11 }
  0x27   : > { %p1307_p9 = pnand %p1306_p8, %p1300_p12 }
  0x29   : > { %1310 = shalt.err (!%p1307_p9)
}
  0x2a   : > { %1133 = dma.hbm_to_vmem [thread:$0]  (!%p1489_p13), %s1487_s15, 192, %s1494_s18, %s213_s19  }
  0x2b   : > { %p1796_p0 = scmp.lt.s32.totalorder %s1377_s24, 3  ;;  %p1797_p1 = scmp.ge.s32.totalorder %s1377_s24, 1 }
  0x2d   : > { %p230_p3 = pnand %p1797_p1, %p1796_p0 }
  0x2e   : > { %s1527_s20 = sand.u32 (!%p230_p3), 1, %s1369_s22  }
  0x2f   : > { %233 = sbr.rel (%p230_p3) target bundleno = 867 (0x363), region = 44  ;;  %s236_s28 = scalar_lea.sflag (!%p230_p3), [#allocation3], %s1527_s20 }
  0x30   : > { %s1124_s26 = smul.u32 (!%p230_p3), 12, %s1527_s20 }
  0x32   : > { %s239_s16 = scalar_lea.vmem (!%p230_p3), [#allocation2], %s1124_s26 }
  0x36   : > { %1356 = dma.done.wait (%p1467_p6), %s236_s28, 192  }
  0x37   : > { %1358 = vsyncadd (%p1467_p6), %s236_s28, 4294967104  ;;  %v1537_v0 = vld [vmem:[%s239_s16 + $0x8] sm:$0xf]  ;;  %v1539_v1 = vld [vmem:[%s239_s16] sm:$0xff]  ;;  %s1380_s15 = smov 18   ;;  %s1381_s18 = smov 1  }
  0x38   : > { %287 = vrot.lane.b32.xlu1 %v1537_v0, %s1380_s15  ;;  %v1545_v2 = vcombine.high %v1539_v1, %v1539_v1  ;;  %v1382_v4 = vmov 0.0|0.0   ;;  %s1383_s7 = smov 17   ;;  %s1384_s19 = smov 19   ;;  %vm1388_vm0 = vmmov 0   ;;  %v1389_v6 = vmov 0.0  }
  0x39   : > { %1109 = vmatprep.subr.bf16.mxu1 %v1382_v4  ;;  %s1385_s29 = smov 110   ;;  %s1386_s11 = smov 127   ;;  %1089 = vmatprep.mubr.msk.f32.mxu1 %vm1388_vm0, %v1389_v6  ;;  %v1391_v7 = vmov 0   ;;  %v418_v8 = vld [vmem:[%s1786_s2] sm:$0x3]  ;;  %vm294_vm1 = vcmask 146432  }
  0x3a   : > { %v1184_v3 = vpack.i.bf16 %v1545_v2, %v1539_v1  ;;  %v1209_v5 = vpack.i.bf16 %v1537_v0, %v1545_v2  ;;  %s1387_s13 = smov 111   ;;  %499 = vmatprep.mubr.f32.mxu0 %v1389_v6  ;;  %s1390_s10 = smov 109   ;;  %1219 = vset.pattern.permute.xlu1 %v1391_v7  ;;  %vm320_vm2 = vcmask 7168   ;;  %vm306_vm3 = vcmask 138240  }
  0x3b   : > { %1255 = vset.pattern.permute.xlu0 %v1391_v7  ;;  %vm280_vm4 = vcmask 154624   ;;  %vm404_vm5 = vcmask 1043456   ;;  %vm331_vm6 = vcmask 1039360   ;;  %vm357_vm7 = vcmask 900096   ;;  %p1798_p11 = scmp.ne.s32.totalorder %s1793_s8, 0 }
  0x3c   : > { %313 = vrot.lane.b32.xlu1 %v1537_v0, %s1381_s18  ;;  %1185 = vrot.lane.b32.xlu0 %v1184_v3, %s1380_s15  ;;  %vm343_vm8 = vcmask 908288   ;;  %vm369_vm9 = vcmask 891904   ;;  %vm424_vm10 = vcmask 293888   ;;  %vm752_vm11 = vcmask 1041408  }
  0x3d   : > { %vm759_vm12 = vcmask 1045504  }
  0x40   : > { %1200 = vrot.lane.b32.xlu1 %v1184_v3, %s1383_s7  ;;  %1190 = vrot.lane.b32.xlu0 %v1184_v3, %s1381_s18 }
  0x44   : > { %299 = vrot.lane.b32.xlu1 %v1537_v0, %s1383_s7  ;;  %1195 = vrot.lane.b32.xlu0 %v1184_v3, %s1384_s19 }
  0x48   : > { %271 = vrot.lane.b32.xlu0 %v1537_v0, %s1384_s19  ;;  %1210 = vrot.lane.b32.xlu1 %v1209_v5, %s1385_s29 }
  0x4c   : > { %1205 = vrot.lane.b32.xlu0 %v1209_v5, %s1386_s11  ;;  %351 = vrot.lane.b32.xlu1 %v1539_v1, %s1385_s29 }
  0x50   : > { %325 = vrot.lane.b32.xlu0 %v1539_v1, %s1386_s11  ;;  %337 = vrot.lane.b32.xlu1 %v1539_v1, %s1387_s13 }
  0x54   : > { %1215 = vrot.lane.b32.xlu0 %v1209_v5, %s1387_s13  ;;  %367 = vrot.lane.b32.xlu1 %v1537_v0, %s1390_s10 }
  0x58   : > { %365 = vrot.lane.b32.xlu0 %v1545_v2, %s1390_s10  ;;  %421 = vperm.xlu1 %1219, %v418_v8  }
  0x5c   : > { %363 = vrot.lane.b32.xlu0 %v1539_v1, %s1390_s10 }
  0xaa   : > { %v288_v9 = vpop.permute.xlu1 %287 }
  0xae   : > { %v314_v10 = vpop.permute.xlu1 %313  ;;  %v1186_v11 = vpop.permute.xlu0 %1185 }
  0xaf   : > { %v1188_v12 = vunpack.i.h.bf16 %v1186_v11  ;;  %v1187_v13 = vunpack.i.l.bf16 %v1186_v11 }
  0xb1   : > { %v295_v22 = vsel %vm294_vm1, %v1187_v13, %v1188_v12  ;;  %v296_v24 = vsel %vm294_vm1, %v1188_v12, %v288_v9  ;;  %v298_v28 = vsel %vm294_vm1, %v288_v9, %v1187_v13 }
  0xb2   : > { %v1201_v14 = vpop.permute.xlu1 %1200  ;;  %v1191_v15 = vpop.permute.xlu0 %1190  ;;  %v377_v34 = vrot.slane %v295_v22, 4  ;;  %v378_v38 = vrot.slane %v296_v24, 4  ;;  %v376_v39 = vrot.slane %v298_v28, 4 }
  0xb3   : > { %v1203_v16 = vunpack.i.h.bf16 %v1201_v14  ;;  %v1202_v17 = vunpack.i.l.bf16 %v1201_v14  ;;  %v1193_v18 = vunpack.i.h.bf16 %v1191_v15  ;;  %v1192_v19 = vunpack.i.l.bf16 %v1191_v15 }
  0xb5   : > { %v322_v20 = vsel %vm320_vm2, %v1193_v18, %v314_v10  ;;  %v324_v21 = vsel %vm320_vm2, %v314_v10, %v1192_v19  ;;  %v321_v23 = vsel %vm320_vm2, %v1192_v19, %v1193_v18  ;;  %v307_v31 = vsel %vm306_vm3, %v1202_v17, %v1203_v16 }
  0xb6   : > { %v300_v25 = vpop.permute.xlu1 %299  ;;  %v1196_v26 = vpop.permute.xlu0 %1195  ;;  %v384_v27 = vrot.slane %v321_v23, 4  ;;  %v385_v32 = vrot.slane %v322_v20, 4  ;;  %v383_v33 = vrot.slane %v324_v21, 4 }
  0xb7   : > { %v1198_v29 = vunpack.i.h.bf16 %v1196_v26  ;;  %v1197_v30 = vunpack.i.l.bf16 %v1196_v26  ;;  %v308_v35 = vsel %vm306_vm3, %v1203_v16, %v300_v25  ;;  %v312_v36 = vsel %vm306_vm3, %v300_v25, %v1202_v17 }
  0xb8   : > { %v409_v42 = vsel %vm404_vm5, %v307_v31, %v384_v27  ;;  %v408_v48 = vsel %vm404_vm5, %v312_v36, %v383_v33  ;;  %v410_v50 = vsel %vm404_vm5, %v308_v35, %v385_v32 }
  0xb9   : > { %v281_v37 = vsel %vm280_vm4, %v1197_v30, %v1198_v29 }
  0xba   : > { %v272_v40 = vpop.permute.xlu0 %271  ;;  %v406_v41 = vsel %vm404_vm5, %v281_v37, %v377_v34  ;;  %v1211_v43 = vpop.permute.xlu1 %1210  ;;  %v417_v34 = vld [vmem:[%s1785_s1] sm:$0x3] }
  0xbb   : > { %v282_v44 = vsel %vm280_vm4, %v1198_v29, %v272_v40  ;;  %v286_v45 = vsel %vm280_vm4, %v272_v40, %v1197_v30  ;;  %v1101_v46 = vpack.c.bf16 %v409_v42, %v406_v41  ;;  %v1213_v57 = vunpack.i.h.bf16 %v1211_v43 }
  0xbc   : > { %v405_v47 = vsel %vm404_vm5, %v286_v45, %v376_v39  ;;  %v407_v49 = vsel %vm404_vm5, %v282_v44, %v378_v38  ;;  %v1212_v58 = vunpack.i.l.bf16 %v1211_v43 }
  0xbd   : > { %1102 = vmatprep.subr.bf16.mxu0 %v1101_v46  ;;  %v1103_v51 = vpack.c.bf16 %v408_v48, %v405_v47  ;;  %v1110_v52 = vpack.c.bf16 %v410_v50, %v407_v49  ;;  %v599_v47 = vlaneseq }
  0xbe   : > { %v1206_v53 = vpop.permute.xlu0 %1205  ;;  %v352_v56 = vpop.permute.xlu1 %351  ;;  %v359_v3 = vsel %vm357_vm7, %v1212_v58, %v1213_v57 }
  0xbf   : > { %v1208_v54 = vunpack.i.h.bf16 %v1206_v53  ;;  %v1207_v55 = vunpack.i.l.bf16 %v1206_v53  ;;  %1104 = vmatpush1.bf16.msra.mxu0 %v1103_v51  ;;  %1111 = vmatpush3.bf16.msra.mxu1 %v1110_v52  ;;  %v358_v5 = vsel %vm357_vm7, %v352_v56, %v1212_v58  ;;  %v362_v7 = vsel %vm357_vm7, %v1213_v57, %v352_v56 }
  0xc0   : > { %1112 = vmatprep.subr.bf16.mxu1 %v1382_v4  ;;  %v399_v14 = vrot.slane %v359_v3, 4  ;;  %v398_v15 = vrot.slane %v358_v5, 4  ;;  %v400_v16 = vrot.slane %v362_v7, 4  ;;  %v600_v53 = vshrl.u32 %v599_v47, 7 }
  0xc1   : > { %v333_v59 = vsel %vm331_vm6, %v1207_v55, %v1208_v54 }
  0xc2   : > { %v326_v60 = vpop.permute.xlu0 %325  ;;  %v392_v63 = vrot.slane %v333_v59, 4  ;;  %v338_v9 = vpop.permute.xlu1 %337  ;;  %v601_v56 = vsub.s32 0, %v600_v53  ;;  %v605_v58 = vsub.s32 1, %v600_v53 }
  0xc3   : > { %v332_v61 = vsel %vm331_vm6, %v326_v60, %v1207_v55  ;;  %v336_v62 = vsel %vm331_vm6, %v1208_v54, %v326_v60  ;;  %v609_v54 = vsub.s32 2, %v600_v53  ;;  %v597_v55 = vld [vmem:[%s1789_s5] sm:$0x7] }
  0xc4   : > { %v393_v8 = vrot.slane %v336_v62, 4  ;;  %v391_v10 = vrot.slane %v332_v61, 4  ;;  %v412_v17 = vsel %vm404_vm5, %v1545_v2, %v392_v63  ;;  %v602_v63 = vrot.slane %v597_v55, %v601_v56 }
  0xc5   : > { %v610_v57 = vrot.slane %v597_v55, %v609_v54 }
  0xc6   : > { %v1216_v11 = vpop.permute.xlu0 %1215  ;;  %v413_v21 = vsel %vm404_vm5, %v1537_v0, %v393_v8  ;;  %v411_v26 = vsel %vm404_vm5, %v1539_v1, %v391_v10  ;;  %v368_v27 = vpop.permute.xlu1 %367  ;;  %v606_v8 = vrot.slane %v597_v55, %v605_v58 }
  0xc7   : > { %v1218_v12 = vunpack.i.h.bf16 %v1216_v11  ;;  %v1217_v13 = vunpack.i.l.bf16 %v1216_v11 }
  0xc9   : > { %v345_v18 = vsel %vm343_vm8, %v1217_v13, %v1218_v12  ;;  %v344_v19 = vsel %vm343_vm8, %v338_v9, %v1217_v13  ;;  %v350_v20 = vsel %vm343_vm8, %v1218_v12, %v338_v9  ;;  %v773_v13 = vld [vmem:[%s1788_s4] sm:$0xf] }
  0xca   : > { %v414_v22 = vsel %vm404_vm5, %v344_v19, %v398_v15  ;;  %v416_v23 = vsel %vm404_vm5, %v350_v20, %v400_v16  ;;  %v366_v24 = vpop.permute.xlu0 %365  ;;  %v415_v25 = vsel %vm404_vm5, %v345_v18, %v399_v14 }
  0xcb   : > { %v1105_v28 = vpack.c.bf16 %v415_v25, %v412_v17  ;;  %v1113_v29 = vpack.c.bf16 %v416_v23, %v413_v21  ;;  %v1107_v30 = vpack.c.bf16 %v414_v22, %v411_v26  ;;  %v371_v31 = vsel %vm369_vm9, %v366_v24, %v368_v27 }
  0xcd   : > { %1106 = vmatprep.subr.bf16.mxu0 %v1105_v28  ;;  %1114 = vmatpush3.bf16.msra.mxu1 %v1113_v29 }
  0xce   : > { %v364_v32 = vpop.permute.xlu0 %363  ;;  %1108 = vmatpush1.bf16.msra.mxu0 %v1107_v30  ;;  %1087 = vmatprep.subr.mxu1 %v1389_v6 }
  0xcf   : > { %v374_v33 = vsel %vm369_vm9, %v368_v27, %v364_v32  ;;  %1050 = vmatprep.subr.msk.mxu0 %vm404_vm5, %v371_v31  ;;  %v370_v35 = vsel %vm369_vm9, %v364_v32, %v366_v24 }
  0xd1   : > { %1088 = vmatpush3.msk.msra.mxu1 %vm404_vm5, %v374_v33 }
  0xd2   : > { %1051 = vmatpush1.msk.msra.mxu0 %vm404_vm5, %v370_v35  ;;  %1090 = vmatmul.mubr.msk.f32.vlgmr.msra.gmra.mrb[0].mxu1 %vm424_vm10, %v417_v34 }
  0xd3   : > { %1052 = vmatmul.mubr.msk.f32.vlgmr.msra.gmra.mrb[0].mxu0 %vm424_vm10, %v417_v34  ;;  %1119 = vmatprep.subr.bf16.mxu1 %v1382_v4 }
  0xd4   : > { %853 = vmatprep.mubr.f32.mxu0 %v1389_v6  ;;  %1098 = vmatprep.mubr.msk.f32.mxu1 %vm1388_vm0, %v1389_v6 }
  0xd7   : > { %v422_v36 = vpop.permute.xlu1 %421 }
 0x1a5   : > { %v572_v37 = vpop.f32.mrb[0].mxu1 }
 0x1a6   : > { %v573_v38 = vadd.f32 %v572_v37, %v422_v36  ;;  %v501_v39 = vpop.f32.mrb[0].mxu0  ;;  %v1091_v40 = vpop.f32.mrb[1].mxu1 }
 0x1a7   : > { %v502_v41 = vadd.f32 %v501_v39, %v422_v36  ;;  %v503_v42 = vpop.f32.mrb[1].mxu0 }
 0x1a8   : > { %v1057_v43 = vmul.f32 -1.442695, %v573_v38  ;;  %v504_v44 = vadd.f32 %v503_v42, %v422_v36 }
 0x1a9   : > { %v1055_v45 = vmul.f32 -1.442695, %v502_v41 }
 0x1aa   : > { %1257 = vpow2.f32 %v1057_v43  ;;  %v1056_v46 = vmul.f32 -1.442695, %v504_v44 }
 0x1ab   : > { %1259 = vpow2.f32 %v1055_v45 }
 0x1ac   : > { %1261 = vpow2.f32 %v1056_v46 }
 0x1b4   : > { %v1258_v4 = vpop.eup %1257 }
 0x1b5   : > { %v1260_v48 = vpop.eup %1259  ;;  %v587_v49 = vadd.f32 1.0, %v1258_v4 }
 0x1b6   : > { %v1262_v50 = vpop.eup %1261  ;;  %v585_v51 = vadd.f32 1.0, %v1260_v48 }
 0x1b7   : > { %1263 = vrcp.f32 %v587_v49  ;;  %v586_v52 = vadd.f32 1.0, %v1262_v50 }
 0x1b8   : > { %1265 = vrcp.f32 %v585_v51 }
 0x1b9   : > { %1267 = vrcp.f32 %v586_v52 }
 0x1c1   : > { %v1264_v59 = vpop.eup %1263 }
 0x1c2   : > { %v1266_v60 = vpop.eup %1265  ;;  %v596_v61 = vmul.f32 %v1264_v59, %v573_v38 }
 0x1c3   : > { %v1268_v62 = vpop.eup %1267  ;;  %v594_v5 = vmul.f32 %v1266_v60, %v502_v41 }
 0x1c4   : > { %v1637_v3 = vmul.f32 %v610_v57, %v596_v61  ;;  %v595_v7 = vmul.f32 %v1268_v62, %v504_v44 }
 0x1c5   : > { %v1643_v9 = vmul.f32 %v602_v63, %v594_v5 }
 0x1c6   : > { %644 = vrot.lane.b32.xlu1 %v1637_v3, %s1383_s7  ;;  %633 = vrot.lane.b32.xlu0 %v1637_v3, %s1380_s15  ;;  %v1645_v10 = vmul.f32 %v606_v8, %v595_v7 }
 0x1c8   : > { %v1220_v11 = vpack.i.bf16 %v1645_v10, %v1643_v9  ;;  %v1225_v12 = vpack.i.bf16 %v1637_v3, %v1645_v10 }
 0x1ca   : > { %618 = vrot.lane.b32.xlu1 %v1637_v3, %s1384_s19  ;;  %666 = vrot.lane.b32.xlu0 %v1643_v9, %s1386_s11 }
 0x1ce   : > { %677 = vrot.lane.b32.xlu1 %v1643_v9, %s1387_s13  ;;  %1221 = vrot.lane.b32.xlu0 %v1220_v11, %s1380_s15 }
 0x1d2   : > { %1226 = vrot.lane.b32.xlu1 %v1225_v12, %s1386_s11  ;;  %1241 = vrot.lane.b32.xlu0 %v1220_v11, %s1384_s19  ;;  %s267_s11 = scalar_lea.vmem [#allocation5], %s1124_s26  ;;  %s1392_s26 = smov [#allocation5]  }
 0x1d3   : > { %s1315_s16 = sshll.u32 %s1392_s26, 4  ;;  %s1316_s16 = int_to_ptr.vmem [resolvable:$false] %s1315_s16 }
 0x1d4   : > { %s1317_s12 = scalar_lea.vmem %s1316_s16, 384 }
 0x1d6   : > { %1231 = vrot.lane.b32.xlu1 %v1220_v11, %s1383_s7  ;;  %1246 = vrot.lane.b32.xlu0 %v1220_v11, %s1381_s18 }
 0x1da   : > { %1236 = vrot.lane.b32.xlu1 %v1225_v12, %s1387_s13  ;;  %1251 = vrot.lane.b32.xlu0 %v1225_v12, %s1385_s29  ;;  %s975_s13 = sshll.u32 %s267_s11, 4  ;;  %s1742_s13 = int_to_ptr.vmem [resolvable:$true] %s975_s13 }
 0x1db   : > { %s1311_s28 = scalar_lea.vmem %s1742_s13, 192  ;;  %p1318_p5 = scmp.lt.s32.totalorder %s1742_s13, %s1316_s16 }
 0x1dc   : > { %p1312_p6 = scmp.ne.s32.totalorder %s1742_s13, %s1311_s28  ;;  %p1319_p10 = scmp.lt.s32.totalorder %s1317_s12, %s1311_s28 }
 0x1de   : > { %688 = vrot.lane.b32.xlu1 %v1643_v9, %s1385_s29  ;;  %655 = vrot.lane.b32.xlu0 %v1637_v3, %s1381_s18  ;;  %s1125_s29 = smul.u32 192, %s1449_s25  ;;  %s961_s25 = scalar_lea.sflag [#allocation4], %s1527_s20 }
 0x1df   : > { %p1313_p12 = pnand %p1312_p6, %p1798_p11  ;;  %p1320_p2 = por %p1319_p10, %p1318_p5 }
 0x1e0   : > { %s1740_s17 = scalar_lea.hbm %s1790_s6, %s1125_s29 }
 0x1e1   : > { %p1314_p13 = pneg %p1313_p12 }
 0x1e2   : > { %703 = vrot.lane.b32.xlu1 %v1637_v3, %s1390_s10  ;;  %701 = vrot.lane.b32.xlu0 %v1645_v10, %s1390_s10 }
 0x1e3   : > { %p1321_p4 = pnand %p1320_p2, %p1314_p13 }
 0x1e6   : > { %776 = vperm.xlu1 %1219, %v773_v13   ;;  %699 = vrot.lane.b32.xlu0 %v1643_v9, %s1390_s10 }
 0x238   : > { %v645_v14 = vpop.permute.xlu1 %644  ;;  %v634_v15 = vpop.permute.xlu0 %633 }
 0x23c   : > { %v619_v16 = vpop.permute.xlu1 %618  ;;  %v667_v17 = vpop.permute.xlu0 %666 }
 0x240   : > { %v678_v18 = vpop.permute.xlu1 %677  ;;  %v1222_v19 = vpop.permute.xlu0 %1221 }
 0x241   : > { %v1224_v20 = vunpack.i.h.bf16 %v1222_v19  ;;  %v1223_v21 = vunpack.i.l.bf16 %v1222_v19 }
 0x243   : > { %v641_v22 = vsel %vm294_vm1, %v1224_v20, %v634_v15  ;;  %v640_v23 = vsel %vm294_vm1, %v1223_v21, %v1224_v20  ;;  %v643_v24 = vsel %vm294_vm1, %v634_v15, %v1223_v21 }
 0x244   : > { %v1227_v25 = vpop.permute.xlu1 %1226  ;;  %v1242_v26 = vpop.permute.xlu0 %1241  ;;  %v713_v31 = vrot.slane %v641_v22, 6  ;;  %v711_v32 = vrot.slane %v643_v24, 6  ;;  %v712_v36 = vrot.slane %v640_v23, 6 }
 0x245   : > { %v1229_v27 = vunpack.i.h.bf16 %v1227_v25  ;;  %v1228_v28 = vunpack.i.l.bf16 %v1227_v25  ;;  %v1244_v29 = vunpack.i.h.bf16 %v1242_v26  ;;  %v1243_v30 = vunpack.i.l.bf16 %v1242_v26 }
 0x247   : > { %v672_v33 = vsel %vm331_vm6, %v667_v17, %v1228_v28  ;;  %v673_v34 = vsel %vm331_vm6, %v1228_v28, %v1229_v27  ;;  %v676_v35 = vsel %vm331_vm6, %v1229_v27, %v667_v17  ;;  %v628_v38 = vsel %vm280_vm4, %v1244_v29, %v619_v16 }
 0x248   : > { %v732_v37 = vrot.slane %v672_v33, 6  ;;  %v627_v39 = vsel %vm280_vm4, %v1243_v30, %v1244_v29  ;;  %v1232_v40 = vpop.permute.xlu1 %1231  ;;  %v1247_v41 = vpop.permute.xlu0 %1246  ;;  %v733_v42 = vrot.slane %v673_v34, 6  ;;  %v734_v43 = vrot.slane %v676_v35, 6 }
 0x249   : > { %v632_v44 = vsel %vm280_vm4, %v619_v16, %v1243_v30  ;;  %v1234_v45 = vunpack.i.h.bf16 %v1232_v40  ;;  %v754_v46 = vsel %vm752_vm11, %v627_v39, %v712_v36  ;;  %v1233_v4 = vunpack.i.l.bf16 %v1232_v40 }
 0x24a   : > { %v1249_v47 = vunpack.i.h.bf16 %v1247_v41  ;;  %v1248_v48 = vunpack.i.l.bf16 %v1247_v41  ;;  %v753_v49 = vsel %vm752_vm11, %v632_v44, %v711_v32  ;;  %v755_v50 = vsel %vm752_vm11, %v628_v38, %v713_v31 }
 0x24b   : > { %v652_v51 = vsel %vm306_vm3, %v1234_v45, %v645_v14  ;;  %v763_v52 = vsel %vm752_vm11, %v1643_v9, %v732_v37  ;;  %v651_v54 = vsel %vm306_vm3, %v1233_v4, %v1234_v45  ;;  %v654_v55 = vsel %vm306_vm3, %v645_v14, %v1233_v4 }
 0x24c   : > { %v720_v53 = vrot.slane %v652_v51, 4  ;;  %v662_v56 = vsel %vm320_vm2, %v1248_v48, %v1249_v47  ;;  %v1237_v57 = vpop.permute.xlu1 %1236  ;;  %v1252_v58 = vpop.permute.xlu0 %1251  ;;  %v719_v59 = vrot.slane %v651_v54, 4  ;;  %v765_v61 = vsel %vm752_vm11, %v1637_v3, %v734_v43 }
 0x24d   : > { %v1239_v60 = vunpack.i.h.bf16 %v1237_v57  ;;  %v764_v62 = vsel %vm752_vm11, %v1645_v10, %v733_v42  ;;  %v718_v63 = vrot.slane %v654_v55, 4  ;;  %v1238_v5 = vunpack.i.l.bf16 %v1237_v57 }
 0x24e   : > { %v1254_v7 = vunpack.i.h.bf16 %v1252_v58  ;;  %v1253_v8 = vunpack.i.l.bf16 %v1252_v58  ;;  %v726_v9 = vrot.slane %v662_v56, 2  ;;  %v758_v12 = vsel %vm404_vm5, %v755_v50, %v720_v53 }
 0x24f   : > { %v687_v11 = vsel %vm343_vm8, %v1239_v60, %v678_v18  ;;  %v757_v13 = vsel %vm404_vm5, %v754_v46, %v719_v59  ;;  %v683_v15 = vsel %vm343_vm8, %v678_v18, %v1238_v5  ;;  %v684_v16 = vsel %vm343_vm8, %v1238_v5, %v1239_v60 }
 0x250   : > { %v741_v14 = vrot.slane %v687_v11, 4  ;;  %v695_v3 = vsel %vm357_vm7, %v1253_v8, %v1254_v7  ;;  %v689_v17 = vpop.permute.xlu1 %688  ;;  %v656_v10 = vpop.permute.xlu0 %655  ;;  %v739_v19 = vrot.slane %v683_v15, 4  ;;  %v740_v20 = vrot.slane %v684_v16, 4 }
 0x251   : > { %v747_v21 = vrot.slane %v695_v3, 2  ;;  %v694_v22 = vsel %vm357_vm7, %v689_v17, %v1253_v8  ;;  %v698_v23 = vsel %vm357_vm7, %v1254_v7, %v689_v17  ;;  %v663_v26 = vsel %vm320_vm2, %v1249_v47, %v656_v10  ;;  %v772_v47 = vld [vmem:[%s1787_s3] sm:$0xf] }
 0x252   : > { %v746_v24 = vrot.slane %v694_v22, 2  ;;  %v768_v25 = vsel %vm404_vm5, %v765_v61, %v741_v14  ;;  %v748_v27 = vrot.slane %v698_v23, 2  ;;  %v766_v18 = vsel %vm404_vm5, %v763_v52, %v739_v19 }
 0x253   : > { %v665_v28 = vsel %vm320_vm2, %v656_v10, %v1248_v48  ;;  %v727_v29 = vrot.slane %v663_v26, 2  ;;  %v756_v32 = vsel %vm404_vm5, %v753_v49, %v718_v63  ;;  %v767_v34 = vsel %vm404_vm5, %v764_v62, %v740_v20 }
 0x254   : > { %v769_v30 = vsel %vm759_vm12, %v766_v18, %v746_v24  ;;  %v725_v31 = vrot.slane %v665_v28, 2  ;;  %v702_v33 = vpop.permute.xlu0 %701  ;;  %v771_v35 = vsel %vm759_vm12, %v768_v25, %v748_v27  ;;  %v761_v37 = vsel %vm759_vm12, %v757_v13, %v726_v9  ;;  %v704_v40 = vpop.permute.xlu1 %703 }
 0x255   : > { %v762_v36 = vsel %vm759_vm12, %v758_v12, %v727_v29  ;;  %v770_v38 = vsel %vm759_vm12, %v767_v34, %v747_v21  ;;  %v706_v45 = vsel %vm369_vm9, %v702_v33, %v704_v40 }
 0x256   : > { %v760_v39 = vsel %vm759_vm12, %v756_v32, %v725_v31  ;;  %v1115_v41 = vpack.c.bf16 %v770_v38, %v761_v37  ;;  %v1120_v42 = vpack.c.bf16 %v771_v35, %v762_v36 }
 0x257   : > { %v1117_v43 = vpack.c.bf16 %v769_v30, %v760_v39 }
 0x258   : > { %1116 = vmatprep.subr.bf16.mxu0 %v1115_v41  ;;  %1121 = vmatpush3.bf16.msra.mxu1 %v1120_v42  ;;  %v700_v44 = vpop.permute.xlu0 %699 }
 0x259   : > { %1118 = vmatpush1.bf16.msra.mxu0 %v1117_v43  ;;  %v709_v46 = vsel %vm369_vm9, %v704_v40, %v700_v44  ;;  %1096 = vmatprep.subr.mxu1 %v1389_v6  ;;  %v705_v4 = vsel %vm369_vm9, %v700_v44, %v702_v33 }
 0x25a   : > { %1058 = vmatprep.subr.msk.mxu0 %vm752_vm11, %v706_v45 }
 0x25c   : > { %1097 = vmatpush3.msk.msra.mxu1 %vm752_vm11, %v709_v46 }
 0x25d   : > { %1059 = vmatpush1.msk.msra.mxu0 %vm752_vm11, %v705_v4  ;;  %1099 = vmatmul.mubr.msk.f32.vlgmr.msra.gmra.mrb[2].mxu1 %vm294_vm1, %v772_v47 }
 0x25e   : > { %1060 = vmatmul.mubr.msk.f32.vlgmr.msra.gmra.mrb[2].mxu0 %vm294_vm1, %v772_v47 }
 0x265   : > { %v777_v48 = vpop.permute.xlu1 %776 }
 0x330   : > { %v926_v49 = vpop.f32.mrb[2].mxu1 }
 0x331   : > { %v855_v50 = vpop.f32.mrb[2].mxu0  ;;  %v927_v6 = vadd.f32 %v926_v49, %v777_v48  ;;  %v1100_v51 = vpop.f32.mrb[3].mxu1 }
 0x332   : > { %v856_v52 = vadd.f32 %v855_v50, %v777_v48  ;;  %v857_v53 = vpop.f32.mrb[3].mxu0 }
 0x333   : > { %v1065_v54 = vmul.f32 -1.442695, %v927_v6  ;;  %v858_v55 = vadd.f32 %v857_v53, %v777_v48 }
 0x334   : > { %v1063_v56 = vmul.f32 -1.442695, %v856_v52 }
 0x335   : > { %1269 = vpow2.f32 %v1065_v54  ;;  %v1064_v57 = vmul.f32 -1.442695, %v858_v55 }
 0x336   : > { %1271 = vpow2.f32 %v1063_v56 }
 0x337   : > { %1273 = vpow2.f32 %v1064_v57 }
 0x33f   : > { %v1270_v58 = vpop.eup %1269 }
 0x340   : > { %v1272_v59 = vpop.eup %1271  ;;  %v941_v60 = vadd.f32 1.0, %v1270_v58 }
 0x341   : > { %v1274_v61 = vpop.eup %1273  ;;  %v939_v62 = vadd.f32 1.0, %v1272_v59 }
 0x342   : > { %1275 = vrcp.f32 %v941_v60  ;;  %v940_v63 = vadd.f32 1.0, %v1274_v61 }
 0x343   : > { %1277 = vrcp.f32 %v939_v62 }
 0x344   : > { %1279 = vrcp.f32 %v940_v63 }
 0x34c   : > { %v1276_v5 = vpop.eup %1275 }
 0x34d   : > { %v1278_v7 = vpop.eup %1277  ;;  %v950_v8 = vmul.f32 %v1276_v5, %v927_v6 }
 0x34e   : > { %v1280_v9 = vpop.eup %1279  ;;  %v948_v11 = vmul.f32 %v1278_v7, %v856_v52 }
 0x34f   : > { %v953_v12 = vadd.f32 %v950_v8, %v1537_v0  ;;  %v949_v13 = vmul.f32 %v1280_v9, %v858_v55 }
 0x350   : > { %v951_v14 = vadd.f32 %v948_v11, %v1539_v1 }
 0x351   : > { %v952_v15 = vadd.f32 %v949_v13, %v1545_v2  ;;  %959 = vst [vmem:[%s267_s11 + $0x8] sm:$0xf] %v953_v12 }
 0x353   : > { %v956_v16 = vcombine.low %v951_v14, %v952_v15 }
 0x355   : > { %958 = vst [vmem:[%s267_s11] sm:$0xff] %v956_v16 }
 0x356   : > { %1324 = shalt.err (!%p1321_p4)
}
 0x357   : > { %s1325_s20 = scalar_lea.hbm %s1740_s17, 192  ;;  %s1329_s18 = scalar_lea.hbm %s1790_s6, 384 }
 0x358   : > { %p1326_p7 = scmp.ne.s32.totalorder %s1740_s17, %s1325_s20  ;;  %p1330_p0 = scmp.lt.u32.totalorder %s1740_s17, %s1790_s6 }
 0x359   : > { %p1331_p1 = scmp.lt.u32.totalorder %s1329_s18, %s1325_s20  ;;  %p1333_p6 = scmp.lt.u32.totalorder %s1325_s20, %s1740_s17 }
 0x35a   : > { %p1327_p8 = pnand %p1326_p7, %p1798_p11 }
 0x35b   : > { %p1332_p3 = por %p1331_p1, %p1330_p0 }
 0x35c   : > { %p1328_p9 = pneg %p1327_p8 }
 0x35d   : > { %p1334_p12 = por %p1333_p6, %p1332_p3 }
 0x35f   : > { %p1335_p13 = pnand %p1334_p12, %p1328_p9 }
 0x361   : > { %1338 = shalt.err (!%p1335_p13)
}
 0x362   : > { %1128 = dma.vmem_to_hbm [thread:$0]  (%p1798_p11), %s1742_s13, 192, %s1740_s17, %s961_s25  }
 0x363 PF: > { %s987_s11 = sand.u32 1, %s1365_s21   ;;  %p1799_p5 = scmp.ne.s32.totalorder %s1794_s9, 0 }
 0x364   : > { %p1800_p10 = scmp.ge.s32.totalorder %s1377_s24, 2  ;;  %s988_s10 = scalar_lea.sflag [#allocation4], %s987_s11 }
 0x366   : > { %p1135_p2 = pnand %p1800_p10, %p1799_p5 }
 0x368   : > { %1360 = dma.done.wait (!%p1135_p2), %s988_s10, 192  }
 0x369   : > { %1362 = vsyncadd (!%p1135_p2), %s988_s10, 4294967104  ;;  %p19_p4 = scmp.ge.s32.totalorder %s1453_s27, 4   ;;  %s1801_s21 = smov %s1369_s22 }
 0x36a   : > { %s1802_s22 = smov %s1373_s23  ;;  %s1803_s23 = smov %s1465_s30 }
 0x36b   : > { %s1804_s24 = smov %s1453_s27  ;;  %21 = sbr.rel (!%p19_p4) target bundleno = 5 (0x5), region = 89 }
 0x372   :  { %993 = vsyncpa [#allocation3], 1 }
 0x373   :  { %995 = vsyncpa [#allocation3 + $0x1], 1 }
 0x374   :  { %996 = vsyncpa [#allocation4], 1 }
 0x375   :  { %998 = vsyncpa [#allocation4 + $0x1], 1 }

</bundles_post_ra>
